<compile_context>
chip_gen: v6e
topology: v6e:2x2x1
jax: 0.10.0
libtpu: 0.0.40
codegen_flags: <defaults>
</compile_context>

<pallas_src>
import functools

import jax
import jax.numpy as jnp
import numpy as np
from jax.experimental import pallas as pl
from jax.experimental.pallas import tpu as pltpu


def _lstm_kernel(x_ref, wih_ref, whh_ref, b_ref, wlin_ref, blin_ref, out_ref,
                 *, seq_len, batch):
    """Whole LSTM forward (all T steps) + fused Linear head in one invocation.

    x_ref   : (T*Bp, Dp)      padded, time-major flattened input
    wih_ref : (Dp, 4*Hp)      gate-padded W_ih^T   (gate g -> cols [g*Hp, g*Hp+H))
    whh_ref : (Hp, 4*Hp)      gate-padded W_hh^T
    b_ref   : (1, 4*Hp)       gate-padded b_ih + b_hh
    wlin_ref: (Hp, Op)        padded W_lin^T
    blin_ref: (1, Op)         padded b_lin
    out_ref : (Bp, Op)
    """
    Hp = whh_ref.shape[0]

    # ---- Input projection hoisted out of the recurrence (no h-dependency). ----
    # One MXU pass over all timesteps + a single bias broadcast.
    xw = (jnp.dot(x_ref[...], wih_ref[...], preferred_element_type=jnp.float32)
          + b_ref[...])                                        # (T*Bp, 4*Hp)

    whh = whh_ref[...]                                         # resident (Hp, 4*Hp)
    h = jnp.zeros((batch, Hp), jnp.float32)
    c = jnp.zeros((batch, Hp), jnp.float32)

    # Static, fully unrolled recurrence: constant, tile-aligned slices
    # (row offsets multiples of 8, gate columns multiples of 128).
    for t in range(seq_len):
        gates = (xw[t * batch:(t + 1) * batch, :]
                 + jnp.dot(h, whh, preferred_element_type=jnp.float32))
        i_g = jax.nn.sigmoid(gates[:, 0 * Hp:1 * Hp])
        f_g = jax.nn.sigmoid(gates[:, 1 * Hp:2 * Hp])
        g_g = jnp.tanh(gates[:, 2 * Hp:3 * Hp])
        o_g = jax.nn.sigmoid(gates[:, 3 * Hp:4 * Hp])
        c = f_g * c + i_g * g_g
        h = o_g * jnp.tanh(c)

    # Fused Linear head; lane-dense (Bp, 128) store, sliced outside.
    out_ref[...] = (jnp.dot(h, wlin_ref[...], preferred_element_type=jnp.float32)
                    + blin_ref[...])


def _round_up(n, m):
    return ((n + m - 1) // m) * m


@jax.jit
def lstm_model_forward(x, w_ih, w_hh, b_ih, b_hh, w_lin, b_lin):
    """x: (T, B, D) or (T, D). Returns (B, output_dim) in float32."""
    if x.ndim == 2:
        x = x[:, None, :]                                      # unsqueeze(1)
    T, B, D = x.shape
    H = w_hh.shape[1]                                          # lstm_dim
    O = w_lin.shape[0]                                         # output_dim

    # Hardware-aligned padded sizes.
    Bp = _round_up(B, 8)                                       # sublane width (f32)
    Dp = _round_up(D, 128)                                     # lane width
    Hp = _round_up(H, 128)                                     # each gate = full lane tile
    Op = _round_up(O, 128)                                     # lane-dense output store

    f32 = jnp.float32
    x = x.astype(f32)
    w_ih = w_ih.astype(f32); w_hh = w_hh.astype(f32)
    b_ih = b_ih.astype(f32); b_hh = b_hh.astype(f32)
    w_lin = w_lin.astype(f32); b_lin = b_lin.astype(f32)

    # --- Pad + pre-transpose weights (gate-major padding: gate g occupies a
    #     full 128-lane tile [g*Hp, g*Hp+H), rest zero so padded hidden units
    #     stay exactly zero through the recurrence). ---
    w_ih_g = jnp.zeros((4, Hp, Dp), f32).at[:, :H, :D].set(w_ih.reshape(4, H, D))
    w_ih_p = jnp.transpose(w_ih_g, (2, 0, 1)).reshape(Dp, 4 * Hp)      # (Dp, 4Hp)

    w_hh_g = jnp.zeros((4, Hp, Hp), f32).at[:, :H, :H].set(w_hh.reshape(4, H, H))
    w_hh_p = jnp.transpose(w_hh_g, (2, 0, 1)).reshape(Hp, 4 * Hp)      # (Hp, 4Hp)

    b_p = (jnp.zeros((4, Hp), f32).at[:, :H].set((b_ih + b_hh).reshape(4, H))
           .reshape(1, 4 * Hp))                                        # (1, 4Hp)

    w_lin_p = jnp.zeros((Hp, Op), f32).at[:H, :O].set(w_lin.T)         # (Hp, Op)
    b_lin_p = jnp.zeros((1, Op), f32).at[0, :O].set(b_lin)             # (1, Op)

    # --- Pad input (batch -> Bp sublanes, feature -> Dp lanes), flatten time. ---
    x_p = jnp.zeros((T, Bp, Dp), f32).at[:, :B, :D].set(x).reshape(T * Bp, Dp)

    out = pl.pallas_call(
        functools.partial(_lstm_kernel, seq_len=T, batch=Bp),
        out_shape=jax.ShapeDtypeStruct((Bp, Op), jnp.float32),
        grid_spec=pltpu.PrefetchScalarGridSpec(
            num_scalar_prefetch=0,
            grid=(1,),                                         # single invocation
            in_specs=[
                pl.BlockSpec((T * Bp, Dp), lambda i: (0, 0)),   # x (whole sequence)
                pl.BlockSpec((Dp, 4 * Hp), lambda i: (0, 0)),   # W_ih^T (padded)
                pl.BlockSpec((Hp, 4 * Hp), lambda i: (0, 0)),   # W_hh^T (padded)
                pl.BlockSpec((1, 4 * Hp), lambda i: (0, 0)),    # b_ih + b_hh
                pl.BlockSpec((Hp, Op), lambda i: (0, 0)),       # W_lin^T (padded)
                pl.BlockSpec((1, Op), lambda i: (0, 0)),        # b_lin
            ],
            out_specs=pl.BlockSpec((Bp, Op), lambda i: (0, 0)),
        ),
        compiler_params=pltpu.CompilerParams(
            dimension_semantics=("arbitrary",)),
    )(x_p, w_ih_p, w_hh_p, b_p, w_lin_p, b_lin_p)

    return out[:B, :O]


def _reference_forward(x, w_ih, w_hh, b_ih, b_hh, w_lin, b_lin):
    """Pure-JAX reference reproducing nn.LSTM (1 layer) + nn.Linear."""
    if x.ndim == 2:
        x = x[:, None, :]
    T, B, D = x.shape
    H = w_hh.shape[1]
    h = jnp.zeros((B, H), jnp.float32)
    c = jnp.zeros((B, H), jnp.float32)

    def step(carry, x_t):
        h, c = carry
        g = x_t @ w_ih.T + b_ih + h @ w_hh.T + b_hh
        i = jax.nn.sigmoid(g[:, 0 * H:1 * H])
        f = jax.nn.sigmoid(g[:, 1 * H:2 * H])
        gg = jnp.tanh(g[:, 2 * H:3 * H])
        o = jax.nn.sigmoid(g[:, 3 * H:4 * H])
        c = f * c + i * gg
        h = o * jnp.tanh(c)
        return (h, c), None

    (h, c), _ = jax.lax.scan(step, (h, c), x)
    return h @ w_lin.T + b_lin


if __name__ == "__main__":
    # Shapes implied by the module: input_dim = 3 (data[:,1:4]),
    # output_dim = 3 (data[:,4:7]), lstm_dim = 64, lstm_layers = 1.
    T, B, D, H, O = 8, 2, 3, 64, 3

    key = jax.random.PRNGKey(0)
    ks = jax.random.split(key, 7)
    k_scale = 1.0 / np.sqrt(H)                # PyTorch default uniform bound

    x = jax.random.normal(ks[0], (T, B, D), jnp.float32)
    w_ih = jax.random.uniform(ks[1], (4 * H, D), jnp.float32, -k_scale, k_scale)
    w_hh = jax.random.uniform(ks[2], (4 * H, H), jnp.float32, -k_scale, k_scale)
    b_ih = jax.random.uniform(ks[3], (4 * H,), jnp.float32, -k_scale, k_scale)
    b_hh = jax.random.uniform(ks[4], (4 * H,), jnp.float32, -k_scale, k_scale)
    w_lin = jax.random.uniform(ks[5], (O, H), jnp.float32, -k_scale, k_scale)
    b_lin = jax.random.uniform(ks[6], (O,), jnp.float32, -k_scale, k_scale)

    out = lstm_model_forward(x, w_ih, w_hh, b_ih, b_hh, w_lin, b_lin)
    out = jax.block_until_ready(out)

    ref = _reference_forward(x, w_ih, w_hh, b_ih, b_hh, w_lin, b_lin)
    np.testing.assert_allclose(np.asarray(out), np.asarray(ref),
                               rtol=1e-5, atol=1e-5)

    print("KERNEL_OK")
</pallas_src>

<mosaic_0001>
module attributes {stable_mosaic.version = 11 : i64} {
  func.func @_lstm_kernel(%arg0: i32, %arg1: memref<64x128xf32, #tpu.memory_space<vmem>>, %arg2: memref<128x512xf32, #tpu.memory_space<vmem>>, %arg3: memref<128x512xf32, #tpu.memory_space<vmem>>, %arg4: memref<1x512xf32, #tpu.memory_space<vmem>>, %arg5: memref<128x128xf32, #tpu.memory_space<vmem>>, %arg6: memref<1x128xf32, #tpu.memory_space<vmem>>, %arg7: memref<8x128xf32, #tpu.memory_space<vmem>>) attributes {dimension_semantics = [#tpu.dimension_semantics<arbitrary>], iteration_bounds = array<i64: 1>, scalar_prefetch = 0 : i64, scratch_operands = 0 : i64, tpu.core_type = #tpu.core_type<tc>, window_params = [{pipeline_mode = #tpu.pipeline_mode<synchronous>, transform_indices = @transform_0, window_bounds = array<i64: 64, 128>}, {pipeline_mode = #tpu.pipeline_mode<synchronous>, transform_indices = @transform_1, window_bounds = array<i64: 128, 512>}, {pipeline_mode = #tpu.pipeline_mode<synchronous>, transform_indices = @transform_2, window_bounds = array<i64: 128, 512>}, {pipeline_mode = #tpu.pipeline_mode<synchronous>, transform_indices = @transform_3, window_bounds = array<i64: 1, 512>}, {pipeline_mode = #tpu.pipeline_mode<synchronous>, transform_indices = @transform_4, window_bounds = array<i64: 128, 128>}, {pipeline_mode = #tpu.pipeline_mode<synchronous>, transform_indices = @transform_5, window_bounds = array<i64: 1, 128>}, {pipeline_mode = #tpu.pipeline_mode<synchronous>, transform_indices = @transform_6, window_bounds = array<i64: 8, 128>}]} {
    %c0 = arith.constant 0 : index
    %c0_0 = arith.constant 0 : index
    %0 = vector.load %arg1[%c0, %c0_0] : memref<64x128xf32, #tpu.memory_space<vmem>>, vector<64x128xf32>
    %c0_1 = arith.constant 0 : index
    %c0_2 = arith.constant 0 : index
    %1 = vector.load %arg2[%c0_1, %c0_2] : memref<128x512xf32, #tpu.memory_space<vmem>>, vector<128x512xf32>
    %cst = arith.constant dense<0.000000e+00> : vector<64x512xf32>
    %2 = tpu.matmul %0, %1, %cst {dimension_numbers = #tpu.dot_dimension_numbers<[1], [0], [0], [1], [0, 0, 1, 1], [], []>} : vector<64x128xf32>, vector<128x512xf32>, vector<64x512xf32> -> vector<64x512xf32>
    %c0_3 = arith.constant 0 : index
    %c0_4 = arith.constant 0 : index
    %3 = vector.load %arg4[%c0_3, %c0_4] : memref<1x512xf32, #tpu.memory_space<vmem>>, vector<1x512xf32>
    %4 = vector.broadcast %3 : vector<1x512xf32> to vector<64x512xf32>
    %5 = arith.addf %2, %4 : vector<64x512xf32>
    %c0_5 = arith.constant 0 : index
    %c0_6 = arith.constant 0 : index
    %6 = vector.load %arg3[%c0_5, %c0_6] : memref<128x512xf32, #tpu.memory_space<vmem>>, vector<128x512xf32>
    %cst_7 = arith.constant 0.000000e+00 : f32
    %7 = vector.broadcast %cst_7 : f32 to vector<8x128xf32>
    %cst_8 = arith.constant 0.000000e+00 : f32
    %8 = vector.broadcast %cst_8 : f32 to vector<8x128xf32>
    %9 = vector.extract_strided_slice %5 {offsets = [0, 0], sizes = [8, 512], strides = [1, 1]} : vector<64x512xf32> to vector<8x512xf32>
    %cst_9 = arith.constant dense<0.000000e+00> : vector<8x512xf32>
    %10 = tpu.matmul %7, %6, %cst_9 {dimension_numbers = #tpu.dot_dimension_numbers<[1], [0], [0], [1], [0, 0, 1, 1], [], []>} : vector<8x128xf32>, vector<128x512xf32>, vector<8x512xf32> -> vector<8x512xf32>
    %11 = arith.addf %9, %10 : vector<8x512xf32>
    %12 = vector.extract_strided_slice %11 {offsets = [0, 0], sizes = [8, 128], strides = [1, 1]} : vector<8x512xf32> to vector<8x128xf32>
    %13 = arith.negf %12 : vector<8x128xf32>
    %14 = math.exp %13 : vector<8x128xf32>
    %cst_10 = arith.constant 1.000000e+00 : f32
    %15 = vector.broadcast %cst_10 : f32 to vector<8x128xf32>
    %16 = arith.addf %15, %14 : vector<8x128xf32>
    %17 = arith.divf %15, %16 : vector<8x128xf32>
    %18 = vector.extract_strided_slice %11 {offsets = [0, 128], sizes = [8, 128], strides = [1, 1]} : vector<8x512xf32> to vector<8x128xf32>
    %19 = arith.negf %18 : vector<8x128xf32>
    %20 = math.exp %19 : vector<8x128xf32>
    %cst_11 = arith.constant 1.000000e+00 : f32
    %21 = vector.broadcast %cst_11 : f32 to vector<8x128xf32>
    %22 = arith.addf %21, %20 : vector<8x128xf32>
    %23 = arith.divf %21, %22 : vector<8x128xf32>
    %24 = vector.extract_strided_slice %11 {offsets = [0, 256], sizes = [8, 128], strides = [1, 1]} : vector<8x512xf32> to vector<8x128xf32>
    %25 = math.tanh %24 : vector<8x128xf32>
    %26 = vector.extract_strided_slice %11 {offsets = [0, 384], sizes = [8, 128], strides = [1, 1]} : vector<8x512xf32> to vector<8x128xf32>
    %27 = arith.negf %26 : vector<8x128xf32>
    %28 = math.exp %27 : vector<8x128xf32>
    %cst_12 = arith.constant 1.000000e+00 : f32
    %29 = vector.broadcast %cst_12 : f32 to vector<8x128xf32>
    %30 = arith.addf %29, %28 : vector<8x128xf32>
    %31 = arith.divf %29, %30 : vector<8x128xf32>
    %32 = arith.mulf %23, %8 : vector<8x128xf32>
    %33 = arith.mulf %17, %25 : vector<8x128xf32>
    %34 = arith.addf %32, %33 : vector<8x128xf32>
    %35 = math.tanh %34 : vector<8x128xf32>
    %36 = arith.mulf %31, %35 : vector<8x128xf32>
    %37 = vector.extract_strided_slice %5 {offsets = [8, 0], sizes = [8, 512], strides = [1, 1]} : vector<64x512xf32> to vector<8x512xf32>
    %cst_13 = arith.constant dense<0.000000e+00> : vector<8x512xf32>
    %38 = tpu.matmul %36, %6, %cst_13 {dimension_numbers = #tpu.dot_dimension_numbers<[1], [0], [0], [1], [0, 0, 1, 1], [], []>} : vector<8x128xf32>, vector<128x512xf32>, vector<8x512xf32> -> vector<8x512xf32>
    %39 = arith.addf %37, %38 : vector<8x512xf32>
    %40 = vector.extract_strided_slice %39 {offsets = [0, 0], sizes = [8, 128], strides = [1, 1]} : vector<8x512xf32> to vector<8x128xf32>
    %41 = arith.negf %40 : vector<8x128xf32>
    %42 = math.exp %41 : vector<8x128xf32>
    %cst_14 = arith.constant 1.000000e+00 : f32
    %43 = vector.broadcast %cst_14 : f32 to vector<8x128xf32>
    %44 = arith.addf %43, %42 : vector<8x128xf32>
    %45 = arith.divf %43, %44 : vector<8x128xf32>
    %46 = vector.extract_strided_slice %39 {offsets = [0, 128], sizes = [8, 128], strides = [1, 1]} : vector<8x512xf32> to vector<8x128xf32>
    %47 = arith.negf %46 : vector<8x128xf32>
    %48 = math.exp %47 : vector<8x128xf32>
    %cst_15 = arith.constant 1.000000e+00 : f32
    %49 = vector.broadcast %cst_15 : f32 to vector<8x128xf32>
    %50 = arith.addf %49, %48 : vector<8x128xf32>
    %51 = arith.divf %49, %50 : vector<8x128xf32>
    %52 = vector.extract_strided_slice %39 {offsets = [0, 256], sizes = [8, 128], strides = [1, 1]} : vector<8x512xf32> to vector<8x128xf32>
    %53 = math.tanh %52 : vector<8x128xf32>
    %54 = vector.extract_strided_slice %39 {offsets = [0, 384], sizes = [8, 128], strides = [1, 1]} : vector<8x512xf32> to vector<8x128xf32>
    %55 = arith.negf %54 : vector<8x128xf32>
    %56 = math.exp %55 : vector<8x128xf32>
    %cst_16 = arith.constant 1.000000e+00 : f32
    %57 = vector.broadcast %cst_16 : f32 to vector<8x128xf32>
    %58 = arith.addf %57, %56 : vector<8x128xf32>
    %59 = arith.divf %57, %58 : vector<8x128xf32>
    %60 = arith.mulf %51, %34 : vector<8x128xf32>
    %61 = arith.mulf %45, %53 : vector<8x128xf32>
    %62 = arith.addf %60, %61 : vector<8x128xf32>
    %63 = math.tanh %62 : vector<8x128xf32>
    %64 = arith.mulf %59, %63 : vector<8x128xf32>
    %65 = vector.extract_strided_slice %5 {offsets = [16, 0], sizes = [8, 512], strides = [1, 1]} : vector<64x512xf32> to vector<8x512xf32>
    %cst_17 = arith.constant dense<0.000000e+00> : vector<8x512xf32>
    %66 = tpu.matmul %64, %6, %cst_17 {dimension_numbers = #tpu.dot_dimension_numbers<[1], [0], [0], [1], [0, 0, 1, 1], [], []>} : vector<8x128xf32>, vector<128x512xf32>, vector<8x512xf32> -> vector<8x512xf32>
    %67 = arith.addf %65, %66 : vector<8x512xf32>
    %68 = vector.extract_strided_slice %67 {offsets = [0, 0], sizes = [8, 128], strides = [1, 1]} : vector<8x512xf32> to vector<8x128xf32>
    %69 = arith.negf %68 : vector<8x128xf32>
    %70 = math.exp %69 : vector<8x128xf32>
    %cst_18 = arith.constant 1.000000e+00 : f32
    %71 = vector.broadcast %cst_18 : f32 to vector<8x128xf32>
    %72 = arith.addf %71, %70 : vector<8x128xf32>
    %73 = arith.divf %71, %72 : vector<8x128xf32>
    %74 = vector.extract_strided_slice %67 {offsets = [0, 128], sizes = [8, 128], strides = [1, 1]} : vector<8x512xf32> to vector<8x128xf32>
    %75 = arith.negf %74 : vector<8x128xf32>
    %76 = math.exp %75 : vector<8x128xf32>
    %cst_19 = arith.constant 1.000000e+00 : f32
    %77 = vector.broadcast %cst_19 : f32 to vector<8x128xf32>
    %78 = arith.addf %77, %76 : vector<8x128xf32>
    %79 = arith.divf %77, %78 : vector<8x128xf32>
    %80 = vector.extract_strided_slice %67 {offsets = [0, 256], sizes = [8, 128], strides = [1, 1]} : vector<8x512xf32> to vector<8x128xf32>
    %81 = math.tanh %80 : vector<8x128xf32>
    %82 = vector.extract_strided_slice %67 {offsets = [0, 384], sizes = [8, 128], strides = [1, 1]} : vector<8x512xf32> to vector<8x128xf32>
    %83 = arith.negf %82 : vector<8x128xf32>
    %84 = math.exp %83 : vector<8x128xf32>
    %cst_20 = arith.constant 1.000000e+00 : f32
    %85 = vector.broadcast %cst_20 : f32 to vector<8x128xf32>
    %86 = arith.addf %85, %84 : vector<8x128xf32>
    %87 = arith.divf %85, %86 : vector<8x128xf32>
    %88 = arith.mulf %79, %62 : vector<8x128xf32>
    %89 = arith.mulf %73, %81 : vector<8x128xf32>
    %90 = arith.addf %88, %89 : vector<8x128xf32>
    %91 = math.tanh %90 : vector<8x128xf32>
    %92 = arith.mulf %87, %91 : vector<8x128xf32>
    %93 = vector.extract_strided_slice %5 {offsets = [24, 0], sizes = [8, 512], strides = [1, 1]} : vector<64x512xf32> to vector<8x512xf32>
    %cst_21 = arith.constant dense<0.000000e+00> : vector<8x512xf32>
    %94 = tpu.matmul %92, %6, %cst_21 {dimension_numbers = #tpu.dot_dimension_numbers<[1], [0], [0], [1], [0, 0, 1, 1], [], []>} : vector<8x128xf32>, vector<128x512xf32>, vector<8x512xf32> -> vector<8x512xf32>
    %95 = arith.addf %93, %94 : vector<8x512xf32>
    %96 = vector.extract_strided_slice %95 {offsets = [0, 0], sizes = [8, 128], strides = [1, 1]} : vector<8x512xf32> to vector<8x128xf32>
    %97 = arith.negf %96 : vector<8x128xf32>
    %98 = math.exp %97 : vector<8x128xf32>
    %cst_22 = arith.constant 1.000000e+00 : f32
    %99 = vector.broadcast %cst_22 : f32 to vector<8x128xf32>
    %100 = arith.addf %99, %98 : vector<8x128xf32>
    %101 = arith.divf %99, %100 : vector<8x128xf32>
    %102 = vector.extract_strided_slice %95 {offsets = [0, 128], sizes = [8, 128], strides = [1, 1]} : vector<8x512xf32> to vector<8x128xf32>
    %103 = arith.negf %102 : vector<8x128xf32>
    %104 = math.exp %103 : vector<8x128xf32>
    %cst_23 = arith.constant 1.000000e+00 : f32
    %105 = vector.broadcast %cst_23 : f32 to vector<8x128xf32>
    %106 = arith.addf %105, %104 : vector<8x128xf32>
    %107 = arith.divf %105, %106 : vector<8x128xf32>
    %108 = vector.extract_strided_slice %95 {offsets = [0, 256], sizes = [8, 128], strides = [1, 1]} : vector<8x512xf32> to vector<8x128xf32>
    %109 = math.tanh %108 : vector<8x128xf32>
    %110 = vector.extract_strided_slice %95 {offsets = [0, 384], sizes = [8, 128], strides = [1, 1]} : vector<8x512xf32> to vector<8x128xf32>
    %111 = arith.negf %110 : vector<8x128xf32>
    %112 = math.exp %111 : vector<8x128xf32>
    %cst_24 = arith.constant 1.000000e+00 : f32
    %113 = vector.broadcast %cst_24 : f32 to vector<8x128xf32>
    %114 = arith.addf %113, %112 : vector<8x128xf32>
    %115 = arith.divf %113, %114 : vector<8x128xf32>
    %116 = arith.mulf %107, %90 : vector<8x128xf32>
    %117 = arith.mulf %101, %109 : vector<8x128xf32>
    %118 = arith.addf %116, %117 : vector<8x128xf32>
    %119 = math.tanh %118 : vector<8x128xf32>
    %120 = arith.mulf %115, %119 : vector<8x128xf32>
    %121 = vector.extract_strided_slice %5 {offsets = [32, 0], sizes = [8, 512], strides = [1, 1]} : vector<64x512xf32> to vector<8x512xf32>
    %cst_25 = arith.constant dense<0.000000e+00> : vector<8x512xf32>
    %122 = tpu.matmul %120, %6, %cst_25 {dimension_numbers = #tpu.dot_dimension_numbers<[1], [0], [0], [1], [0, 0, 1, 1], [], []>} : vector<8x128xf32>, vector<128x512xf32>, vector<8x512xf32> -> vector<8x512xf32>
    %123 = arith.addf %121, %122 : vector<8x512xf32>
    %124 = vector.extract_strided_slice %123 {offsets = [0, 0], sizes = [8, 128], strides = [1, 1]} : vector<8x512xf32> to vector<8x128xf32>
    %125 = arith.negf %124 : vector<8x128xf32>
    %126 = math.exp %125 : vector<8x128xf32>
    %cst_26 = arith.constant 1.000000e+00 : f32
    %127 = vector.broadcast %cst_26 : f32 to vector<8x128xf32>
    %128 = arith.addf %127, %126 : vector<8x128xf32>
    %129 = arith.divf %127, %128 : vector<8x128xf32>
    %130 = vector.extract_strided_slice %123 {offsets = [0, 128], sizes = [8, 128], strides = [1, 1]} : vector<8x512xf32> to vector<8x128xf32>
    %131 = arith.negf %130 : vector<8x128xf32>
    %132 = math.exp %131 : vector<8x128xf32>
    %cst_27 = arith.constant 1.000000e+00 : f32
    %133 = vector.broadcast %cst_27 : f32 to vector<8x128xf32>
    %134 = arith.addf %133, %132 : vector<8x128xf32>
    %135 = arith.divf %133, %134 : vector<8x128xf32>
    %136 = vector.extract_strided_slice %123 {offsets = [0, 256], sizes = [8, 128], strides = [1, 1]} : vector<8x512xf32> to vector<8x128xf32>
    %137 = math.tanh %136 : vector<8x128xf32>
    %138 = vector.extract_strided_slice %123 {offsets = [0, 384], sizes = [8, 128], strides = [1, 1]} : vector<8x512xf32> to vector<8x128xf32>
    %139 = arith.negf %138 : vector<8x128xf32>
    %140 = math.exp %139 : vector<8x128xf32>
    %cst_28 = arith.constant 1.000000e+00 : f32
    %141 = vector.broadcast %cst_28 : f32 to vector<8x128xf32>
    %142 = arith.addf %141, %140 : vector<8x128xf32>
    %143 = arith.divf %141, %142 : vector<8x128xf32>
    %144 = arith.mulf %135, %118 : vector<8x128xf32>
    %145 = arith.mulf %129, %137 : vector<8x128xf32>
    %146 = arith.addf %144, %145 : vector<8x128xf32>
    %147 = math.tanh %146 : vector<8x128xf32>
    %148 = arith.mulf %143, %147 : vector<8x128xf32>
    %149 = vector.extract_strided_slice %5 {offsets = [40, 0], sizes = [8, 512], strides = [1, 1]} : vector<64x512xf32> to vector<8x512xf32>
    %cst_29 = arith.constant dense<0.000000e+00> : vector<8x512xf32>
    %150 = tpu.matmul %148, %6, %cst_29 {dimension_numbers = #tpu.dot_dimension_numbers<[1], [0], [0], [1], [0, 0, 1, 1], [], []>} : vector<8x128xf32>, vector<128x512xf32>, vector<8x512xf32> -> vector<8x512xf32>
    %151 = arith.addf %149, %150 : vector<8x512xf32>
    %152 = vector.extract_strided_slice %151 {offsets = [0, 0], sizes = [8, 128], strides = [1, 1]} : vector<8x512xf32> to vector<8x128xf32>
    %153 = arith.negf %152 : vector<8x128xf32>
    %154 = math.exp %153 : vector<8x128xf32>
    %cst_30 = arith.constant 1.000000e+00 : f32
    %155 = vector.broadcast %cst_30 : f32 to vector<8x128xf32>
    %156 = arith.addf %155, %154 : vector<8x128xf32>
    %157 = arith.divf %155, %156 : vector<8x128xf32>
    %158 = vector.extract_strided_slice %151 {offsets = [0, 128], sizes = [8, 128], strides = [1, 1]} : vector<8x512xf32> to vector<8x128xf32>
    %159 = arith.negf %158 : vector<8x128xf32>
    %160 = math.exp %159 : vector<8x128xf32>
    %cst_31 = arith.constant 1.000000e+00 : f32
    %161 = vector.broadcast %cst_31 : f32 to vector<8x128xf32>
    %162 = arith.addf %161, %160 : vector<8x128xf32>
    %163 = arith.divf %161, %162 : vector<8x128xf32>
    %164 = vector.extract_strided_slice %151 {offsets = [0, 256], sizes = [8, 128], strides = [1, 1]} : vector<8x512xf32> to vector<8x128xf32>
    %165 = math.tanh %164 : vector<8x128xf32>
    %166 = vector.extract_strided_slice %151 {offsets = [0, 384], sizes = [8, 128], strides = [1, 1]} : vector<8x512xf32> to vector<8x128xf32>
    %167 = arith.negf %166 : vector<8x128xf32>
    %168 = math.exp %167 : vector<8x128xf32>
    %cst_32 = arith.constant 1.000000e+00 : f32
    %169 = vector.broadcast %cst_32 : f32 to vector<8x128xf32>
    %170 = arith.addf %169, %168 : vector<8x128xf32>
    %171 = arith.divf %169, %170 : vector<8x128xf32>
    %172 = arith.mulf %163, %146 : vector<8x128xf32>
    %173 = arith.mulf %157, %165 : vector<8x128xf32>
    %174 = arith.addf %172, %173 : vector<8x128xf32>
    %175 = math.tanh %174 : vector<8x128xf32>
    %176 = arith.mulf %171, %175 : vector<8x128xf32>
    %177 = vector.extract_strided_slice %5 {offsets = [48, 0], sizes = [8, 512], strides = [1, 1]} : vector<64x512xf32> to vector<8x512xf32>
    %cst_33 = arith.constant dense<0.000000e+00> : vector<8x512xf32>
    %178 = tpu.matmul %176, %6, %cst_33 {dimension_numbers = #tpu.dot_dimension_numbers<[1], [0], [0], [1], [0, 0, 1, 1], [], []>} : vector<8x128xf32>, vector<128x512xf32>, vector<8x512xf32> -> vector<8x512xf32>
    %179 = arith.addf %177, %178 : vector<8x512xf32>
    %180 = vector.extract_strided_slice %179 {offsets = [0, 0], sizes = [8, 128], strides = [1, 1]} : vector<8x512xf32> to vector<8x128xf32>
    %181 = arith.negf %180 : vector<8x128xf32>
    %182 = math.exp %181 : vector<8x128xf32>
    %cst_34 = arith.constant 1.000000e+00 : f32
    %183 = vector.broadcast %cst_34 : f32 to vector<8x128xf32>
    %184 = arith.addf %183, %182 : vector<8x128xf32>
    %185 = arith.divf %183, %184 : vector<8x128xf32>
    %186 = vector.extract_strided_slice %179 {offsets = [0, 128], sizes = [8, 128], strides = [1, 1]} : vector<8x512xf32> to vector<8x128xf32>
    %187 = arith.negf %186 : vector<8x128xf32>
    %188 = math.exp %187 : vector<8x128xf32>
    %cst_35 = arith.constant 1.000000e+00 : f32
    %189 = vector.broadcast %cst_35 : f32 to vector<8x128xf32>
    %190 = arith.addf %189, %188 : vector<8x128xf32>
    %191 = arith.divf %189, %190 : vector<8x128xf32>
    %192 = vector.extract_strided_slice %179 {offsets = [0, 256], sizes = [8, 128], strides = [1, 1]} : vector<8x512xf32> to vector<8x128xf32>
    %193 = math.tanh %192 : vector<8x128xf32>
    %194 = vector.extract_strided_slice %179 {offsets = [0, 384], sizes = [8, 128], strides = [1, 1]} : vector<8x512xf32> to vector<8x128xf32>
    %195 = arith.negf %194 : vector<8x128xf32>
    %196 = math.exp %195 : vector<8x128xf32>
    %cst_36 = arith.constant 1.000000e+00 : f32
    %197 = vector.broadcast %cst_36 : f32 to vector<8x128xf32>
    %198 = arith.addf %197, %196 : vector<8x128xf32>
    %199 = arith.divf %197, %198 : vector<8x128xf32>
    %200 = arith.mulf %191, %174 : vector<8x128xf32>
    %201 = arith.mulf %185, %193 : vector<8x128xf32>
    %202 = arith.addf %200, %201 : vector<8x128xf32>
    %203 = math.tanh %202 : vector<8x128xf32>
    %204 = arith.mulf %199, %203 : vector<8x128xf32>
    %205 = vector.extract_strided_slice %5 {offsets = [56, 0], sizes = [8, 512], strides = [1, 1]} : vector<64x512xf32> to vector<8x512xf32>
    %cst_37 = arith.constant dense<0.000000e+00> : vector<8x512xf32>
    %206 = tpu.matmul %204, %6, %cst_37 {dimension_numbers = #tpu.dot_dimension_numbers<[1], [0], [0], [1], [0, 0, 1, 1], [], []>} : vector<8x128xf32>, vector<128x512xf32>, vector<8x512xf32> -> vector<8x512xf32>
    %207 = arith.addf %205, %206 : vector<8x512xf32>
    %208 = vector.extract_strided_slice %207 {offsets = [0, 0], sizes = [8, 128], strides = [1, 1]} : vector<8x512xf32> to vector<8x128xf32>
    %209 = arith.negf %208 : vector<8x128xf32>
    %210 = math.exp %209 : vector<8x128xf32>
    %cst_38 = arith.constant 1.000000e+00 : f32
    %211 = vector.broadcast %cst_38 : f32 to vector<8x128xf32>
    %212 = arith.addf %211, %210 : vector<8x128xf32>
    %213 = arith.divf %211, %212 : vector<8x128xf32>
    %214 = vector.extract_strided_slice %207 {offsets = [0, 128], sizes = [8, 128], strides = [1, 1]} : vector<8x512xf32> to vector<8x128xf32>
    %215 = arith.negf %214 : vector<8x128xf32>
    %216 = math.exp %215 : vector<8x128xf32>
    %cst_39 = arith.constant 1.000000e+00 : f32
    %217 = vector.broadcast %cst_39 : f32 to vector<8x128xf32>
    %218 = arith.addf %217, %216 : vector<8x128xf32>
    %219 = arith.divf %217, %218 : vector<8x128xf32>
    %220 = vector.extract_strided_slice %207 {offsets = [0, 256], sizes = [8, 128], strides = [1, 1]} : vector<8x512xf32> to vector<8x128xf32>
    %221 = math.tanh %220 : vector<8x128xf32>
    %222 = vector.extract_strided_slice %207 {offsets = [0, 384], sizes = [8, 128], strides = [1, 1]} : vector<8x512xf32> to vector<8x128xf32>
    %223 = arith.negf %222 : vector<8x128xf32>
    %224 = math.exp %223 : vector<8x128xf32>
    %cst_40 = arith.constant 1.000000e+00 : f32
    %225 = vector.broadcast %cst_40 : f32 to vector<8x128xf32>
    %226 = arith.addf %225, %224 : vector<8x128xf32>
    %227 = arith.divf %225, %226 : vector<8x128xf32>
    %228 = arith.mulf %219, %202 : vector<8x128xf32>
    %229 = arith.mulf %213, %221 : vector<8x128xf32>
    %230 = arith.addf %228, %229 : vector<8x128xf32>
    %231 = math.tanh %230 : vector<8x128xf32>
    %232 = arith.mulf %227, %231 : vector<8x128xf32>
    %c0_41 = arith.constant 0 : index
    %c0_42 = arith.constant 0 : index
    %233 = vector.load %arg5[%c0_41, %c0_42] : memref<128x128xf32, #tpu.memory_space<vmem>>, vector<128x128xf32>
    %cst_43 = arith.constant dense<0.000000e+00> : vector<8x128xf32>
    %234 = tpu.matmul %232, %233, %cst_43 {dimension_numbers = #tpu.dot_dimension_numbers<[1], [0], [0], [1], [0, 0, 1, 1], [], []>} : vector<8x128xf32>, vector<128x128xf32>, vector<8x128xf32> -> vector<8x128xf32>
    %c0_44 = arith.constant 0 : index
    %c0_45 = arith.constant 0 : index
    %235 = vector.load %arg6[%c0_44, %c0_45] : memref<1x128xf32, #tpu.memory_space<vmem>>, vector<1x128xf32>
    %236 = vector.broadcast %235 : vector<1x128xf32> to vector<8x128xf32>
    %237 = arith.addf %234, %236 : vector<8x128xf32>
    %c0_46 = arith.constant 0 : index
    %c0_47 = arith.constant 0 : index
    %238 = vector.load %arg7[%c0_46, %c0_47] : memref<8x128xf32, #tpu.memory_space<vmem>>, vector<8x128xf32>
    tpu.vector_store %arg7[%c0_46, %c0_47], %237 {strides = array<i32>} : memref<8x128xf32, #tpu.memory_space<vmem>>, vector<8x128xf32>,
    return
  }
  func.func @transform_0(%arg0: i32) -> (i32, i32) {
    %c0_i32 = arith.constant 0 : i32
    %c0_i32_0 = arith.constant 0 : i32
    %c0_i32_1 = arith.constant 0 : i32
    return %c0_i32, %c0_i32_0 : i32, i32
  }
  func.func @transform_1(%arg0: i32) -> (i32, i32) {
    %c0_i32 = arith.constant 0 : i32
    %c0_i32_0 = arith.constant 0 : i32
    %c0_i32_1 = arith.constant 0 : i32
    return %c0_i32, %c0_i32_0 : i32, i32
  }
  func.func @transform_2(%arg0: i32) -> (i32, i32) {
    %c0_i32 = arith.constant 0 : i32
    %c0_i32_0 = arith.constant 0 : i32
    %c0_i32_1 = arith.constant 0 : i32
    return %c0_i32, %c0_i32_0 : i32, i32
  }
  func.func @transform_3(%arg0: i32) -> (i32, i32) {
    %c0_i32 = arith.constant 0 : i32
    %c0_i32_0 = arith.constant 0 : i32
    %c0_i32_1 = arith.constant 0 : i32
    return %c0_i32, %c0_i32_0 : i32, i32
  }
  func.func @transform_4(%arg0: i32) -> (i32, i32) {
    %c0_i32 = arith.constant 0 : i32
    %c0_i32_0 = arith.constant 0 : i32
    %c0_i32_1 = arith.constant 0 : i32
    return %c0_i32, %c0_i32_0 : i32, i32
  }
  func.func @transform_5(%arg0: i32) -> (i32, i32) {
    %c0_i32 = arith.constant 0 : i32
    %c0_i32_0 = arith.constant 0 : i32
    %c0_i32_1 = arith.constant 0 : i32
    return %c0_i32, %c0_i32_0 : i32, i32
  }
  func.func @transform_6(%arg0: i32) -> (i32, i32) {
    %c0_i32 = arith.constant 0 : i32
    %c0_i32_0 = arith.constant 0 : i32
    %c0_i32_1 = arith.constant 0 : i32
    return %c0_i32, %c0_i32_0 : i32, i32
  }
}

</mosaic_0001>

<bundles_post_ra>
// kernel: lstm_model_forward.1
= control target key start
LH: loop header
LB: loop body
LE: loop exit
PB: predicated region body
PF: predicated region fallthrough
CT: control target
= control target key end

     0   :  { %v3800_v3 = vmov 0.0   ;;  %vm2137_vm0 = vmmov 0   ;;  %s3793_s1 = inlined_call_operand.vmem [shape: f32[128,512], index: 1, kind: input, shape index: {}]   ;;  %s3794_s0 = inlined_call_operand.vmem [shape: f32[64,128], index: 0, kind: input, shape index: {}]   ;;  %s3795_s2 = inlined_call_operand.vmem [shape: f32[128,512], index: 2, kind: input, shape index: {}]   ;;  %s3796_s3 = inlined_call_operand.vmem [shape: f32[1,512], index: 3, kind: input, shape index: {}]   ;;  %s3797_s4 = inlined_call_operand.vmem [shape: f32[128,128], index: 4, kind: input, shape index: {}]   ;;  %s3798_s5 = inlined_call_operand.vmem [shape: f32[1,128], index: 5, kind: input, shape index: {}]   ;;  %s3799_s6 = inlined_call_operand.vmem [shape: f32[8,128], index: 6, kind: output, shape index: {}]  }
   0x1   :  { %v92_v0 = vld [vmem:[%s3793_s1 + $0x1e8] sm:$0xff]  ;;  %v94_v1 = vld [vmem:[%s3793_s1 + $0x1f8] sm:$0xff]  ;;  %v91_v2 = vld [vmem:[%s3793_s1 + $0x1e0] sm:$0xff]  ;;  %181 = vmatprep.mubr.f32.mxu0 %v3800_v3  ;;  %294 = vmatprep.mubr.f32.mxu1 %v3800_v3 }
   0x2   :  { %117 = vmatprep.subr.mxu0 %v92_v0  ;;  %230 = vmatprep.subr.mxu1 %v94_v1  ;;  %v93_v4 = vld [vmem:[%s3793_s1 + $0x1f0] sm:$0xff]  ;;  %v88_v5 = vld [vmem:[%s3793_s1 + $0x1c8] sm:$0xff]  ;;  %v90_v6 = vld [vmem:[%s3793_s1 + $0x1d8] sm:$0xff] }
   0x3   :  { %118 = vmatpush1.msra.mxu0 %v91_v2  ;;  %231 = vmatpush1.msra.mxu1 %v93_v4  ;;  %v87_v7 = vld [vmem:[%s3793_s1 + $0x1c0] sm:$0xff]  ;;  %v89_v8 = vld [vmem:[%s3793_s1 + $0x1d0] sm:$0xff]  ;;  %v84_v9 = vld [vmem:[%s3793_s1 + $0x1a8] sm:$0xff] }
   0x4   :  { %119 = vmatprep.subr.mxu0 %v88_v5  ;;  %232 = vmatprep.subr.mxu1 %v90_v6  ;;  %v86_v10 = vld [vmem:[%s3793_s1 + $0x1b8] sm:$0xff]  ;;  %v83_v11 = vld [vmem:[%s3793_s1 + $0x1a0] sm:$0xff]  ;;  %v85_v12 = vld [vmem:[%s3793_s1 + $0x1b0] sm:$0xff] }
   0x5   :  { %120 = vmatpush1.msra.mxu0 %v87_v7  ;;  %233 = vmatpush1.msra.mxu1 %v89_v8  ;;  %v80_v13 = vld [vmem:[%s3793_s1 + $0x188] sm:$0xff]  ;;  %v82_v14 = vld [vmem:[%s3793_s1 + $0x198] sm:$0xff]  ;;  %v79_v15 = vld [vmem:[%s3793_s1 + $0x180] sm:$0xff] }
   0x6   :  { %121 = vmatprep.subr.mxu0 %v84_v9  ;;  %234 = vmatprep.subr.mxu1 %v86_v10  ;;  %v81_v16 = vld [vmem:[%s3793_s1 + $0x190] sm:$0xff]  ;;  %v76_v17 = vld [vmem:[%s3793_s1 + $0x168] sm:$0xff]  ;;  %v78_v18 = vld [vmem:[%s3793_s1 + $0x178] sm:$0xff] }
   0x7   :  { %122 = vmatpush1.msra.mxu0 %v83_v11  ;;  %235 = vmatpush1.msra.mxu1 %v85_v12  ;;  %v75_v19 = vld [vmem:[%s3793_s1 + $0x160] sm:$0xff]  ;;  %v77_v20 = vld [vmem:[%s3793_s1 + $0x170] sm:$0xff]  ;;  %v72_v21 = vld [vmem:[%s3793_s1 + $0x148] sm:$0xff] }
   0x8   :  { %123 = vmatprep.subr.mxu0 %v80_v13  ;;  %236 = vmatprep.subr.mxu1 %v82_v14  ;;  %v74_v22 = vld [vmem:[%s3793_s1 + $0x158] sm:$0xff]  ;;  %v71_v23 = vld [vmem:[%s3793_s1 + $0x140] sm:$0xff]  ;;  %v73_v24 = vld [vmem:[%s3793_s1 + $0x150] sm:$0xff] }
   0x9   :  { %124 = vmatpush1.msra.mxu0 %v79_v15  ;;  %237 = vmatpush1.msra.mxu1 %v81_v16  ;;  %v68_v25 = vld [vmem:[%s3793_s1 + $0x128] sm:$0xff]  ;;  %v70_v26 = vld [vmem:[%s3793_s1 + $0x138] sm:$0xff]  ;;  %v67_v27 = vld [vmem:[%s3793_s1 + $0x120] sm:$0xff] }
   0xa   :  { %125 = vmatprep.subr.mxu0 %v76_v17  ;;  %238 = vmatprep.subr.mxu1 %v78_v18  ;;  %v69_v28 = vld [vmem:[%s3793_s1 + $0x130] sm:$0xff]  ;;  %v64_v29 = vld [vmem:[%s3793_s1 + $0x108] sm:$0xff]  ;;  %v66_v30 = vld [vmem:[%s3793_s1 + $0x118] sm:$0xff] }
   0xb   :  { %126 = vmatpush1.msra.mxu0 %v75_v19  ;;  %239 = vmatpush1.msra.mxu1 %v77_v20  ;;  %v63_v31 = vld [vmem:[%s3793_s1 + $0x100] sm:$0xff]  ;;  %v65_v32 = vld [vmem:[%s3793_s1 + $0x110] sm:$0xff]  ;;  %v60_v33 = vld [vmem:[%s3793_s1 + $0xe8] sm:$0xff] }
   0xc   :  { %127 = vmatprep.subr.mxu0 %v72_v21  ;;  %240 = vmatprep.subr.mxu1 %v74_v22  ;;  %v62_v34 = vld [vmem:[%s3793_s1 + $0xf8] sm:$0xff]  ;;  %v59_v35 = vld [vmem:[%s3793_s1 + $0xe0] sm:$0xff]  ;;  %v61_v36 = vld [vmem:[%s3793_s1 + $0xf0] sm:$0xff] }
   0xd   :  { %128 = vmatpush1.msra.mxu0 %v71_v23  ;;  %241 = vmatpush1.msra.mxu1 %v73_v24  ;;  %v56_v37 = vld [vmem:[%s3793_s1 + $0xc8] sm:$0xff]  ;;  %v58_v38 = vld [vmem:[%s3793_s1 + $0xd8] sm:$0xff]  ;;  %v55_v39 = vld [vmem:[%s3793_s1 + $0xc0] sm:$0xff] }
   0xe   :  { %129 = vmatprep.subr.mxu0 %v68_v25  ;;  %242 = vmatprep.subr.mxu1 %v70_v26  ;;  %v57_v40 = vld [vmem:[%s3793_s1 + $0xd0] sm:$0xff]  ;;  %v52_v41 = vld [vmem:[%s3793_s1 + $0xa8] sm:$0xff]  ;;  %v54_v42 = vld [vmem:[%s3793_s1 + $0xb8] sm:$0xff] }
   0xf   :  { %130 = vmatpush1.msra.mxu0 %v67_v27  ;;  %243 = vmatpush1.msra.mxu1 %v69_v28  ;;  %v51_v43 = vld [vmem:[%s3793_s1 + $0xa0] sm:$0xff]  ;;  %v53_v44 = vld [vmem:[%s3793_s1 + $0xb0] sm:$0xff]  ;;  %v48_v45 = vld [vmem:[%s3793_s1 + $0x88] sm:$0xff] }
  0x10   :  { %131 = vmatprep.subr.mxu0 %v64_v29  ;;  %244 = vmatprep.subr.mxu1 %v66_v30  ;;  %v50_v46 = vld [vmem:[%s3793_s1 + $0x98] sm:$0xff]  ;;  %v47_v47 = vld [vmem:[%s3793_s1 + $0x80] sm:$0xff]  ;;  %v49_v48 = vld [vmem:[%s3793_s1 + $0x90] sm:$0xff] }
  0x11   :  { %132 = vmatpush1.msra.mxu0 %v63_v31  ;;  %245 = vmatpush1.msra.mxu1 %v65_v32  ;;  %v44_v49 = vld [vmem:[%s3793_s1 + $0x68] sm:$0xff]  ;;  %v46_v50 = vld [vmem:[%s3793_s1 + $0x78] sm:$0xff]  ;;  %v43_v51 = vld [vmem:[%s3793_s1 + $0x60] sm:$0xff] }
  0x12   :  { %133 = vmatprep.subr.mxu0 %v60_v33  ;;  %246 = vmatprep.subr.mxu1 %v62_v34  ;;  %v45_v52 = vld [vmem:[%s3793_s1 + $0x70] sm:$0xff]  ;;  %v40_v53 = vld [vmem:[%s3793_s1 + $0x48] sm:$0xff]  ;;  %v42_v54 = vld [vmem:[%s3793_s1 + $0x58] sm:$0xff] }
  0x13   :  { %134 = vmatpush1.msra.mxu0 %v59_v35  ;;  %247 = vmatpush1.msra.mxu1 %v61_v36  ;;  %v39_v55 = vld [vmem:[%s3793_s1 + $0x40] sm:$0xff]  ;;  %v41_v56 = vld [vmem:[%s3793_s1 + $0x50] sm:$0xff]  ;;  %v36_v57 = vld [vmem:[%s3793_s1 + $0x28] sm:$0xff] }
  0x14   :  { %135 = vmatprep.subr.mxu0 %v56_v37  ;;  %248 = vmatprep.subr.mxu1 %v58_v38  ;;  %v38_v58 = vld [vmem:[%s3793_s1 + $0x38] sm:$0xff]  ;;  %v35_v59 = vld [vmem:[%s3793_s1 + $0x20] sm:$0xff]  ;;  %v37_v60 = vld [vmem:[%s3793_s1 + $0x30] sm:$0xff] }
  0x15   :  { %136 = vmatpush1.msra.mxu0 %v55_v39  ;;  %249 = vmatpush1.msra.mxu1 %v57_v40  ;;  %v32_v61 = vld [vmem:[%s3793_s1 + $0x8] sm:$0xff]  ;;  %v34_v62 = vld [vmem:[%s3793_s1 + $0x18] sm:$0xff]  ;;  %v31_v63 = vld [vmem:[%s3793_s1] sm:$0xff] }
  0x16   :  { %137 = vmatprep.subr.mxu0 %v52_v41  ;;  %250 = vmatprep.subr.mxu1 %v54_v42  ;;  %v33_v0 = vld [vmem:[%s3793_s1 + $0x10] sm:$0xff]  ;;  %v23_v1 = vld [vmem:[%s3794_s0] sm:$0xff]  ;;  %v2373_v2 = vld [vmem:[%s3795_s2 + $0x1e8] sm:$0xff] }
  0x17   :  { %138 = vmatpush1.msra.mxu0 %v51_v43  ;;  %251 = vmatpush1.msra.mxu1 %v53_v44  ;;  %3888 = vst [vmem:[#allocation2_spill] sm:$0xff] %v2373_v2  ;;  %v2378_v4 = vld [vmem:[%s3795_s2 + $0x1f8] sm:$0xff]  ;;  %v2383_v5 = vld [vmem:[%s3795_s2 + $0x1e0] sm:$0xff]  ;;  %v2388_v6 = vld [vmem:[%s3795_s2 + $0x1f0] sm:$0xff] }
  0x18   :  { %139 = vmatprep.subr.mxu0 %v48_v45  ;;  %252 = vmatprep.subr.mxu1 %v50_v46  ;;  %3889 = vst [vmem:[#allocation3_spill] sm:$0xff] %v2378_v4  ;;  %v2393_v7 = vld [vmem:[%s3795_s2 + $0x1c8] sm:$0xff]  ;;  %v2398_v8 = vld [vmem:[%s3795_s2 + $0x1d8] sm:$0xff]  ;;  %v2407_v9 = vld [vmem:[%s3795_s2 + $0x1c0] sm:$0xff] }
  0x19   :  { %140 = vmatpush1.msra.mxu0 %v47_v47  ;;  %253 = vmatpush1.msra.mxu1 %v49_v48  ;;  %v2412_v10 = vld [vmem:[%s3795_s2 + $0x1d0] sm:$0xff]  ;;  %v24_v11 = vld [vmem:[%s3794_s0 + $0x8] sm:$0xff]  ;;  %v2429_v13 = vld [vmem:[%s3795_s2 + $0x1b8] sm:$0xff] }
  0x1a   :  { %141 = vmatprep.subr.mxu0 %v44_v49  ;;  %254 = vmatprep.subr.mxu1 %v46_v50  ;;  %v2424_v12 = vld [vmem:[%s3795_s2 + $0x1a8] sm:$0xff]  ;;  %v2436_v14 = vld [vmem:[%s3795_s2 + $0x1a0] sm:$0xff]  ;;  %v2441_v15 = vld [vmem:[%s3795_s2 + $0x1b0] sm:$0xff] }
  0x1b   :  { %142 = vmatpush1.msra.mxu0 %v43_v51  ;;  %255 = vmatpush1.msra.mxu1 %v45_v52  ;;  %v2446_v16 = vld [vmem:[%s3795_s2 + $0x188] sm:$0xff]  ;;  %v2451_v17 = vld [vmem:[%s3795_s2 + $0x198] sm:$0xff]  ;;  %v2460_v18 = vld [vmem:[%s3795_s2 + $0x180] sm:$0xff] }
  0x1c   :  { %143 = vmatprep.subr.mxu0 %v40_v53  ;;  %256 = vmatprep.subr.mxu1 %v42_v54  ;;  %v2465_v19 = vld [vmem:[%s3795_s2 + $0x190] sm:$0xff]  ;;  %v2477_v21 = vld [vmem:[%s3795_s2 + $0x168] sm:$0xff]  ;;  %v2482_v22 = vld [vmem:[%s3795_s2 + $0x178] sm:$0xff] }
  0x1d   :  { %144 = vmatpush1.msra.mxu0 %v39_v55  ;;  %257 = vmatpush1.msra.mxu1 %v41_v56  ;;  %v25_v20 = vld [vmem:[%s3794_s0 + $0x10] sm:$0xff]  ;;  %v2489_v23 = vld [vmem:[%s3795_s2 + $0x160] sm:$0xff]  ;;  %v2499_v25 = vld [vmem:[%s3795_s2 + $0x148] sm:$0xff] }
  0x1e   :  { %145 = vmatprep.subr.mxu0 %v36_v57  ;;  %258 = vmatprep.subr.mxu1 %v38_v58  ;;  %v2494_v24 = vld [vmem:[%s3795_s2 + $0x170] sm:$0xff]  ;;  %v2504_v26 = vld [vmem:[%s3795_s2 + $0x158] sm:$0xff]  ;;  %v2513_v27 = vld [vmem:[%s3795_s2 + $0x140] sm:$0xff] }
  0x1f   :  { %146 = vmatpush1.msra.mxu0 %v35_v59  ;;  %259 = vmatpush1.msra.mxu1 %v37_v60  ;;  %v2518_v28 = vld [vmem:[%s3795_s2 + $0x150] sm:$0xff]  ;;  %v26_v29 = vld [vmem:[%s3794_s0 + $0x18] sm:$0xff]  ;;  %v2530_v30 = vld [vmem:[%s3795_s2 + $0x128] sm:$0xff] }
  0x20   :  { %147 = vmatprep.subr.mxu0 %v32_v61  ;;  %260 = vmatprep.subr.mxu1 %v34_v62  ;;  %v2535_v31 = vld [vmem:[%s3795_s2 + $0x138] sm:$0xff]  ;;  %v2542_v32 = vld [vmem:[%s3795_s2 + $0x120] sm:$0xff]  ;;  %v2547_v33 = vld [vmem:[%s3795_s2 + $0x130] sm:$0xff] }
  0x21   :  { %148 = vmatpush1.msra.mxu0 %v31_v63  ;;  %261 = vmatpush1.msra.mxu1 %v33_v0  ;;  %v2552_v34 = vld [vmem:[%s3795_s2 + $0x108] sm:$0xff]  ;;  %v2557_v35 = vld [vmem:[%s3795_s2 + $0x118] sm:$0xff]  ;;  %v2566_v36 = vld [vmem:[%s3795_s2 + $0x100] sm:$0xff] }
  0x22   :  { %182 = vmatmul.mubr.f32.vlgmr.msra.gmra.mxu0 %v23_v1  ;;  %295 = vmatmul.mubr.f32.vlgmr.msra.gmra.mxu1 %v23_v1  ;;  %v2571_v37 = vld [vmem:[%s3795_s2 + $0x110] sm:$0xff]  ;;  %v27_v38 = vld [vmem:[%s3794_s0 + $0x20] sm:$0xff]  ;;  %v2583_v39 = vld [vmem:[%s3795_s2 + $0xe8] sm:$0xff] }
  0x23   :  { %407 = vmatprep.subr.mxu0 %v2373_v2  ;;  %478 = vmatprep.subr.mxu1 %v2378_v4  ;;  %v2588_v40 = vld [vmem:[%s3795_s2 + $0xf8] sm:$0xff]  ;;  %v2595_v41 = vld [vmem:[%s3795_s2 + $0xe0] sm:$0xff]  ;;  %v2600_v42 = vld [vmem:[%s3795_s2 + $0xf0] sm:$0xff] }
  0x24   :  { %408 = vmatpush1.msra.mxu0 %v2383_v5  ;;  %479 = vmatpush1.msra.mxu1 %v2388_v6  ;;  %v2605_v43 = vld [vmem:[%s3795_s2 + $0xc8] sm:$0xff]  ;;  %v2610_v44 = vld [vmem:[%s3795_s2 + $0xd8] sm:$0xff]  ;;  %v2619_v45 = vld [vmem:[%s3795_s2 + $0xc0] sm:$0xff] }
  0x25   :  { %409 = vmatprep.subr.mxu0 %v2393_v7  ;;  %480 = vmatprep.subr.mxu1 %v2398_v8  ;;  %v2624_v46 = vld [vmem:[%s3795_s2 + $0xd0] sm:$0xff]  ;;  %v28_v47 = vld [vmem:[%s3794_s0 + $0x28] sm:$0xff]  ;;  %v2641_v49 = vld [vmem:[%s3795_s2 + $0xb8] sm:$0xff] }
  0x26   :  { %187 = vmatprep.mubr.f32.mxu0 %v3800_v3  ;;  %300 = vmatprep.mubr.f32.mxu1 %v3800_v3  ;;  %v2636_v48 = vld [vmem:[%s3795_s2 + $0xa8] sm:$0xff]  ;;  %v2648_v50 = vld [vmem:[%s3795_s2 + $0xa0] sm:$0xff]  ;;  %v2653_v51 = vld [vmem:[%s3795_s2 + $0xb0] sm:$0xff] }
  0x27   :  { %410 = vmatpush1.msra.mxu0 %v2407_v9  ;;  %481 = vmatpush1.msra.mxu1 %v2412_v10  ;;  %v2658_v52 = vld [vmem:[%s3795_s2 + $0x88] sm:$0xff]  ;;  %v2663_v53 = vld [vmem:[%s3795_s2 + $0x98] sm:$0xff]  ;;  %v2672_v54 = vld [vmem:[%s3795_s2 + $0x80] sm:$0xff] }
  0x28   :  { %188 = vmatmul.mubr.f32.gmra.mxu0 %v24_v11  ;;  %301 = vmatmul.mubr.f32.gmra.mxu1 %v24_v11  ;;  %3890 = vst [vmem:[#allocation4_spill] sm:$0xff] %v2658_v52  ;;  %3891 = vst [vmem:[#allocation5_spill] sm:$0xff] %v2663_v53  ;;  %v2677_v55 = vld [vmem:[%s3795_s2 + $0x90] sm:$0xff]  ;;  %v2689_v57 = vld [vmem:[%s3795_s2 + $0x68] sm:$0xff] }
  0x29   :  { %411 = vmatprep.subr.mxu0 %v2424_v12  ;;  %482 = vmatprep.subr.mxu1 %v2429_v13  ;;  %3892 = vst [vmem:[#allocation6_spill] sm:$0xff] %v2672_v54  ;;  %3893 = vst [vmem:[#allocation7_spill] sm:$0xff] %v2677_v55  ;;  %v29_v56 = vld [vmem:[%s3794_s0 + $0x30] sm:$0xff]  ;;  %v2694_v58 = vld [vmem:[%s3795_s2 + $0x78] sm:$0xff] }
  0x2a   :  { %412 = vmatpush1.msra.mxu0 %v2436_v14  ;;  %483 = vmatpush1.msra.mxu1 %v2441_v15  ;;  %3894 = vst [vmem:[#allocation8_spill] sm:$0xff] %v2689_v57  ;;  %3895 = vst [vmem:[#allocation9_spill] sm:$0xff] %v2694_v58  ;;  %v2701_v59 = vld [vmem:[%s3795_s2 + $0x60] sm:$0xff]  ;;  %v2706_v60 = vld [vmem:[%s3795_s2 + $0x70] sm:$0xff] }
  0x2b   :  { %413 = vmatprep.subr.mxu0 %v2446_v16  ;;  %484 = vmatprep.subr.mxu1 %v2451_v17  ;;  %3896 = vst [vmem:[#allocation10_spill] sm:$0xff] %v2701_v59  ;;  %3897 = vst [vmem:[#allocation11_spill] sm:$0xff] %v2706_v60  ;;  %v2711_v61 = vld [vmem:[%s3795_s2 + $0x48] sm:$0xff]  ;;  %v2716_v62 = vld [vmem:[%s3795_s2 + $0x58] sm:$0xff] }
  0x2c   :  { %193 = vmatprep.mubr.f32.mxu0 %v3800_v3  ;;  %306 = vmatprep.mubr.f32.mxu1 %v3800_v3  ;;  %3898 = vst [vmem:[#allocation12_spill] sm:$0xff] %v2711_v61  ;;  %3899 = vst [vmem:[#allocation13_spill] sm:$0xff] %v2716_v62  ;;  %v2725_v63 = vld [vmem:[%s3795_s2 + $0x40] sm:$0xff]  ;;  %v2730_v0 = vld [vmem:[%s3795_s2 + $0x50] sm:$0xff] }
  0x2d   :  { %414 = vmatpush1.msra.mxu0 %v2460_v18  ;;  %485 = vmatpush1.msra.mxu1 %v2465_v19  ;;  %3900 = vst [vmem:[#allocation14_spill] sm:$0xff] %v2725_v63  ;;  %3901 = vst [vmem:[#allocation15_spill] sm:$0xff] %v2730_v0  ;;  %v30_v1 = vld [vmem:[%s3794_s0 + $0x38] sm:$0xff]  ;;  %v2742_v11 = vld [vmem:[%s3795_s2 + $0x28] sm:$0xff] }
  0x2e   :  { %194 = vmatmul.mubr.f32.gmra.mxu0 %v25_v20  ;;  %307 = vmatmul.mubr.f32.gmra.mxu1 %v25_v20  ;;  %3902 = vst [vmem:[#allocation16_spill] sm:$0xff] %v2742_v11  ;;  %v2747_v20 = vld [vmem:[%s3795_s2 + $0x38] sm:$0xff] }
  0x2f   :  { %415 = vmatprep.subr.mxu0 %v2477_v21  ;;  %486 = vmatprep.subr.mxu1 %v2482_v22  ;;  %3903 = vst [vmem:[#allocation17_spill] sm:$0xff] %v2747_v20 }
  0x30   :  { %416 = vmatpush1.msra.mxu0 %v2489_v23  ;;  %487 = vmatpush1.msra.mxu1 %v2494_v24 }
  0x31   :  { %417 = vmatprep.subr.mxu0 %v2499_v25  ;;  %488 = vmatprep.subr.mxu1 %v2504_v26 }
  0x32   :  { %199 = vmatprep.mubr.f32.mxu0 %v3800_v3  ;;  %312 = vmatprep.mubr.f32.mxu1 %v3800_v3 }
  0x33   :  { %418 = vmatpush1.msra.mxu0 %v2513_v27  ;;  %489 = vmatpush1.msra.mxu1 %v2518_v28 }
  0x34   :  { %200 = vmatmul.mubr.f32.gmra.mxu0 %v26_v29  ;;  %313 = vmatmul.mubr.f32.gmra.mxu1 %v26_v29  ;;  %v2754_v29 = vld [vmem:[%s3795_s2 + $0x20] sm:$0xff] }
  0x35   :  { %419 = vmatprep.subr.mxu0 %v2530_v30  ;;  %490 = vmatprep.subr.mxu1 %v2535_v31  ;;  %3904 = vst [vmem:[#allocation18_spill] sm:$0xff] %v2754_v29 }
  0x36   :  { %420 = vmatpush1.msra.mxu0 %v2542_v32  ;;  %491 = vmatpush1.msra.mxu1 %v2547_v33 }
  0x37   :  { %421 = vmatprep.subr.mxu0 %v2552_v34  ;;  %492 = vmatprep.subr.mxu1 %v2557_v35 }
  0x38   :  { %205 = vmatprep.mubr.f32.mxu0 %v3800_v3  ;;  %318 = vmatprep.mubr.f32.mxu1 %v3800_v3 }
  0x39   :  { %422 = vmatpush1.msra.mxu0 %v2566_v36  ;;  %493 = vmatpush1.msra.mxu1 %v2571_v37 }
  0x3a   :  { %206 = vmatmul.mubr.f32.gmra.mxu0 %v27_v38  ;;  %319 = vmatmul.mubr.f32.gmra.mxu1 %v27_v38  ;;  %v2759_v38 = vld [vmem:[%s3795_s2 + $0x30] sm:$0xff] }
  0x3b   :  { %423 = vmatprep.subr.mxu0 %v2583_v39  ;;  %494 = vmatprep.subr.mxu1 %v2588_v40  ;;  %3905 = vst [vmem:[#allocation19_spill] sm:$0xff] %v2759_v38 }
  0x3c   :  { %424 = vmatpush1.msra.mxu0 %v2595_v41  ;;  %495 = vmatpush1.msra.mxu1 %v2600_v42 }
  0x3d   :  { %425 = vmatprep.subr.mxu0 %v2605_v43  ;;  %496 = vmatprep.subr.mxu1 %v2610_v44 }
  0x3e   :  { %211 = vmatprep.mubr.f32.mxu0 %v3800_v3  ;;  %324 = vmatprep.mubr.f32.mxu1 %v3800_v3 }
  0x3f   :  { %426 = vmatpush1.msra.mxu0 %v2619_v45  ;;  %497 = vmatpush1.msra.mxu1 %v2624_v46 }
  0x40   :  { %212 = vmatmul.mubr.f32.gmra.mxu0 %v28_v47  ;;  %325 = vmatmul.mubr.f32.gmra.mxu1 %v28_v47  ;;  %v2764_v47 = vld [vmem:[%s3795_s2 + $0x8] sm:$0xff] }
  0x41   :  { %427 = vmatprep.subr.mxu0 %v2636_v48  ;;  %498 = vmatprep.subr.mxu1 %v2641_v49  ;;  %3906 = vst [vmem:[#allocation20_spill] sm:$0xff] %v2764_v47 }
  0x42   :  { %428 = vmatpush1.msra.mxu0 %v2648_v50  ;;  %499 = vmatpush1.msra.mxu1 %v2653_v51 }
  0x43   :  { %429 = vmatprep.subr.mxu0 %v2658_v52  ;;  %500 = vmatprep.subr.mxu1 %v2663_v53 }
  0x44   :  { %217 = vmatprep.mubr.f32.mxu0 %v3800_v3  ;;  %330 = vmatprep.mubr.f32.mxu1 %v3800_v3 }
  0x45   :  { %430 = vmatpush1.msra.mxu0 %v2672_v54  ;;  %501 = vmatpush1.msra.mxu1 %v2677_v55 }
  0x46   :  { %218 = vmatmul.mubr.f32.gmra.mxu0 %v29_v56  ;;  %331 = vmatmul.mubr.f32.gmra.mxu1 %v29_v56  ;;  %v2769_v56 = vld [vmem:[%s3795_s2 + $0x18] sm:$0xff] }
  0x47   :  { %431 = vmatprep.subr.mxu0 %v2689_v57  ;;  %502 = vmatprep.subr.mxu1 %v2694_v58  ;;  %3907 = vst [vmem:[#allocation21_spill] sm:$0xff] %v2769_v56 }
  0x48   :  { %432 = vmatpush1.msra.mxu0 %v2701_v59  ;;  %503 = vmatpush1.msra.mxu1 %v2706_v60 }
  0x49   :  { %433 = vmatprep.subr.mxu0 %v2711_v61  ;;  %504 = vmatprep.subr.mxu1 %v2716_v62 }
  0x4a   :  { %223 = vmatprep.mubr.f32.mxu0 %v3800_v3  ;;  %336 = vmatprep.mubr.f32.mxu1 %v3800_v3  ;;  %v2776_v3 = vld [vmem:[%s3795_s2] sm:$0xff] }
  0x4b   :  { %434 = vmatpush1.msra.mxu0 %v2725_v63  ;;  %505 = vmatpush1.msra.mxu1 %v2730_v0  ;;  %3908 = vst [vmem:[#allocation22_spill] sm:$0xff] %v2776_v3 }
  0x4c   :  { %224 = vmatmul.mubr.f32.gmra.mxu0 %v30_v1  ;;  %337 = vmatmul.mubr.f32.gmra.mxu1 %v30_v1  ;;  %v2783_v1 = vld [vmem:[%s3795_s2 + $0x10] sm:$0xff] }
  0x4d   :  { %435 = vmatprep.subr.mxu0 %v2742_v11  ;;  %506 = vmatprep.subr.mxu1 %v2747_v20  ;;  %3909 = vst [vmem:[#allocation23_spill] sm:$0xff] %v2783_v1  ;;  %v3910_v20 = vmov 0.0  }
  0x4e   :  { %436 = vmatpush1.msra.mxu0 %v2754_v29  ;;  %507 = vmatpush1.msra.mxu1 %v2759_v38 }
  0x4f   :  { %437 = vmatprep.subr.mxu0 %v2764_v47  ;;  %508 = vmatprep.subr.mxu1 %v2769_v56 }
  0x50   :  { %438 = vmatpush1.msra.mxu0 %v2776_v3  ;;  %471 = vmatprep.mubr.f32.mxu0 %v3910_v20 }
  0x51   :  { %509 = vmatpush1.msra.mxu1 %v2783_v1  ;;  %542 = vmatprep.mubr.f32.mxu1 %v3910_v20 }
  0x52   :  { %472 = vmatmul.mubr.f32.vlgmr.msra.gmra.mxu0 %v3910_v20  ;;  %543 = vmatmul.mubr.f32.vlgmr.msra.gmra.mxu1 %v3910_v20 }
  0x53   :  { %577 = vmatprep.subr.mxu0 %v2373_v2  ;;  %648 = vmatprep.subr.mxu1 %v2378_v4 }
  0x54   :  { %578 = vmatpush1.msra.mxu0 %v2383_v5  ;;  %649 = vmatpush1.msra.mxu1 %v2388_v6 }
  0x55   :  { %579 = vmatprep.subr.mxu0 %v2393_v7  ;;  %650 = vmatprep.subr.mxu1 %v2398_v8 }
  0x56   :  { %580 = vmatpush1.msra.mxu0 %v2407_v9  ;;  %651 = vmatpush1.msra.mxu1 %v2412_v10 }
  0x57   :  { %581 = vmatprep.subr.mxu0 %v2424_v12  ;;  %652 = vmatprep.subr.mxu1 %v2429_v13 }
  0x58   :  { %582 = vmatpush1.msra.mxu0 %v2436_v14  ;;  %653 = vmatpush1.msra.mxu1 %v2441_v15 }
  0x59   :  { %583 = vmatprep.subr.mxu0 %v2446_v16  ;;  %654 = vmatprep.subr.mxu1 %v2451_v17 }
  0x5a   :  { %584 = vmatpush1.msra.mxu0 %v2460_v18  ;;  %655 = vmatpush1.msra.mxu1 %v2465_v19 }
  0x5b   :  { %585 = vmatprep.subr.mxu0 %v2477_v21  ;;  %656 = vmatprep.subr.mxu1 %v2482_v22 }
  0x5c   :  { %586 = vmatpush1.msra.mxu0 %v2489_v23  ;;  %657 = vmatpush1.msra.mxu1 %v2494_v24 }
  0x5d   :  { %587 = vmatprep.subr.mxu0 %v2499_v25  ;;  %658 = vmatprep.subr.mxu1 %v2504_v26 }
  0x5e   :  { %588 = vmatpush1.msra.mxu0 %v2513_v27  ;;  %659 = vmatpush1.msra.mxu1 %v2518_v28 }
  0x5f   :  { %589 = vmatprep.subr.mxu0 %v2530_v30  ;;  %660 = vmatprep.subr.mxu1 %v2535_v31 }
  0x60   :  { %590 = vmatpush1.msra.mxu0 %v2542_v32  ;;  %661 = vmatpush1.msra.mxu1 %v2547_v33 }
  0x61   :  { %591 = vmatprep.subr.mxu0 %v2552_v34  ;;  %662 = vmatprep.subr.mxu1 %v2557_v35 }
  0x62   :  { %592 = vmatpush1.msra.mxu0 %v2566_v36  ;;  %663 = vmatpush1.msra.mxu1 %v2571_v37 }
  0x63   :  { %593 = vmatprep.subr.mxu0 %v2583_v39  ;;  %664 = vmatprep.subr.mxu1 %v2588_v40 }
  0x64   :  { %594 = vmatpush1.msra.mxu0 %v2595_v41  ;;  %665 = vmatpush1.msra.mxu1 %v2600_v42 }
  0x65   :  { %595 = vmatprep.subr.mxu0 %v2605_v43  ;;  %666 = vmatprep.subr.mxu1 %v2610_v44 }
  0x66   :  { %596 = vmatpush1.msra.mxu0 %v2619_v45  ;;  %667 = vmatpush1.msra.mxu1 %v2624_v46 }
  0x67   :  { %597 = vmatprep.subr.mxu0 %v2636_v48  ;;  %668 = vmatprep.subr.mxu1 %v2641_v49 }
  0x68   :  { %598 = vmatpush1.msra.mxu0 %v2648_v50  ;;  %669 = vmatpush1.msra.mxu1 %v2653_v51 }
  0x69   :  { %599 = vmatprep.subr.mxu0 %v2658_v52  ;;  %670 = vmatprep.subr.mxu1 %v2663_v53 }
  0x6a   :  { %600 = vmatpush1.msra.mxu0 %v2672_v54  ;;  %671 = vmatpush1.msra.mxu1 %v2677_v55  ;;  %v3911_v54 = vld [vmem:[#allocation17_spill] sm:$0xff] }
  0x6b   :  { %601 = vmatprep.subr.mxu0 %v2689_v57  ;;  %672 = vmatprep.subr.mxu1 %v2694_v58 }
  0x6c   :  { %602 = vmatpush1.msra.mxu0 %v2701_v59  ;;  %673 = vmatpush1.msra.mxu1 %v2706_v60 }
  0x6d   :  { %603 = vmatprep.subr.mxu0 %v2711_v61  ;;  %674 = vmatprep.subr.mxu1 %v2716_v62 }
  0x6e   :  { %604 = vmatpush1.msra.mxu0 %v2725_v63  ;;  %675 = vmatpush1.msra.mxu1 %v2730_v0 }
  0x6f   :  { %605 = vmatprep.subr.mxu0 %v2742_v11  ;;  %676 = vmatprep.subr.mxu1 %v3911_v54  ;;  %v97_v54 = vlaneseq }
  0x70   :  { %606 = vmatpush1.msra.mxu0 %v2754_v29  ;;  %677 = vmatpush1.msra.mxu1 %v2759_v38 }
  0x71   :  { %607 = vmatprep.subr.mxu0 %v2764_v47  ;;  %678 = vmatprep.subr.mxu1 %v2769_v56  ;;  %v98_v29 = vshrl.u32 %v97_v54, 7 }
  0x72   :  { %608 = vmatpush1.msra.mxu0 %v2776_v3  ;;  %641 = vmatprep.mubr.f32.mxu0 %v3910_v20  ;;  %v95_v3 = vld [vmem:[%s3796_s3] sm:$0xf] }
  0x73   :  { %679 = vmatpush1.msra.mxu1 %v2783_v1  ;;  %712 = vmatprep.mubr.f32.mxu1 %v3910_v20  ;;  %v99_v47 = vsub.s32 0, %v98_v29  ;;  %v107_v56 = vsub.s32 2, %v98_v29  ;;  %v103_v20 = vsub.s32 1, %v98_v29 }
  0x74   :  { %747 = vmatprep.subr.mxu0 %v2373_v2  ;;  %818 = vmatprep.subr.mxu1 %v2378_v4  ;;  %v111_v2 = vsub.s32 3, %v98_v29 }
  0x75   :  { %v100_v63 = vrot.slane %v95_v3, %v99_v47  ;;  %v2872_v4 = vrot.slane %v95_v3, %v107_v56  ;;  %v104_v61 = vrot.slane %v95_v3, %v103_v20 }
  0x76   :  { %v2874_v60 = vrot.slane %v95_v3, %v111_v2 }
  0xe2   :  { %v2861_v11 = vpop.f32.mrf.mxu0  ;;  %v2863_v38 = vpop.f32.mrf.mxu1 }
  0xe4   :  { %v2868_v0 = vpop.f32.mrf.mxu0  ;;  %v2870_v1 = vpop.f32.mrf.mxu1 }
  0xe8   :  { %v189_v54 = vpop.f32.mrf.mxu0  ;;  %v302_v62 = vpop.f32.mrf.mxu1 }
  0xe9   :  { %v2876_v59 = vadd.f32 %v189_v54, %v100_v63  ;;  %v2879_v58 = vadd.f32 %v302_v62, %v2872_v4 }
  0xea   :  { %v191_v57 = vpop.f32.mrf.mxu0  ;;  %v304_v55 = vpop.f32.mrf.mxu1 }
  0xeb   :  { %3912 = vst [vmem:[#allocation24_spill] sm:$0xff] %v2876_v59  ;;  %3913 = vst [vmem:[#allocation25_spill] sm:$0xff] %v2879_v58  ;;  %v2881_v53 = vadd.f32 %v191_v57, %v104_v61  ;;  %v2884_v52 = vadd.f32 %v304_v55, %v2874_v60 }
  0xed   :  { %3914 = vst [vmem:[#allocation26_spill] sm:$0xff] %v2881_v53  ;;  %3915 = vst [vmem:[#allocation27_spill] sm:$0xff] %v2884_v52 }
  0xee   :  { %v195_v29 = vpop.f32.mrf.mxu0  ;;  %v308_v47 = vpop.f32.mrf.mxu1 }
  0xef   :  { %v2886_v56 = vadd.f32 %v195_v29, %v100_v63  ;;  %v2889_v20 = vadd.f32 %v308_v47, %v2872_v4 }
  0xf0   :  { %v197_v3 = vpop.f32.mrf.mxu0  ;;  %v310_v2 = vpop.f32.mrf.mxu1 }
  0xf1   :  { %3916 = vst [vmem:[#allocation28_spill] sm:$0xff] %v2886_v56  ;;  %3917 = vst [vmem:[#allocation29_spill] sm:$0xff] %v2889_v20  ;;  %v2891_v54 = vadd.f32 %v197_v3, %v104_v61  ;;  %v2894_v62 = vadd.f32 %v310_v2, %v2874_v60 }
  0xf3   :  { %3918 = vst [vmem:[#allocation30_spill] sm:$0xff] %v2891_v54  ;;  %3919 = vst [vmem:[#allocation31_spill] sm:$0xff] %v2894_v62 }
  0xf4   :  { %v201_v58 = vpop.f32.mrf.mxu0  ;;  %v314_v57 = vpop.f32.mrf.mxu1 }
  0xf5   :  { %v2896_v53 = vadd.f32 %v201_v58, %v100_v63  ;;  %v2899_v55 = vadd.f32 %v314_v57, %v2872_v4 }
  0xf6   :  { %v203_v52 = vpop.f32.mrf.mxu0  ;;  %v316_v29 = vpop.f32.mrf.mxu1 }
  0xf7   :  { %3920 = vst [vmem:[#allocation32_spill] sm:$0xff] %v2896_v53  ;;  %3921 = vst [vmem:[#allocation33_spill] sm:$0xff] %v2899_v55  ;;  %v2901_v56 = vadd.f32 %v203_v52, %v104_v61  ;;  %v2904_v47 = vadd.f32 %v316_v29, %v2874_v60 }
  0xf9   :  { %3922 = vst [vmem:[#allocation34_spill] sm:$0xff] %v2901_v56  ;;  %3923 = vst [vmem:[#allocation35_spill] sm:$0xff] %v2904_v47 }
  0xfa   :  { %v207_v20 = vpop.f32.mrf.mxu0  ;;  %v320_v3 = vpop.f32.mrf.mxu1 }
  0xfb   :  { %v2906_v54 = vadd.f32 %v207_v20, %v100_v63  ;;  %v2909_v2 = vadd.f32 %v320_v3, %v2872_v4 }
  0xfc   :  { %v209_v62 = vpop.f32.mrf.mxu0  ;;  %v322_v58 = vpop.f32.mrf.mxu1 }
  0xfd   :  { %3924 = vst [vmem:[#allocation36_spill] sm:$0xff] %v2906_v54  ;;  %3925 = vst [vmem:[#allocation37_spill] sm:$0xff] %v2909_v2  ;;  %v2911_v53 = vadd.f32 %v209_v62, %v104_v61  ;;  %v2914_v57 = vadd.f32 %v322_v58, %v2874_v60 }
  0xff   :  { %3926 = vst [vmem:[#allocation38_spill] sm:$0xff] %v2911_v53  ;;  %3927 = vst [vmem:[#allocation39_spill] sm:$0xff] %v2914_v57 }
 0x100   :  { %v213_v55 = vpop.f32.mrf.mxu0  ;;  %v326_v52 = vpop.f32.mrf.mxu1 }
 0x101   :  { %v2916_v56 = vadd.f32 %v213_v55, %v100_v63  ;;  %v2919_v29 = vadd.f32 %v326_v52, %v2872_v4 }
 0x102   :  { %v215_v47 = vpop.f32.mrf.mxu0  ;;  %v328_v20 = vpop.f32.mrf.mxu1 }
 0x103   :  { %3928 = vst [vmem:[#allocation40_spill] sm:$0xff] %v2916_v56  ;;  %3929 = vst [vmem:[#allocation41_spill] sm:$0xff] %v2919_v29  ;;  %v2921_v54 = vadd.f32 %v215_v47, %v104_v61  ;;  %v2924_v3 = vadd.f32 %v328_v20, %v2874_v60 }
 0x105   :  { %3930 = vst [vmem:[#allocation42_spill] sm:$0xff] %v2921_v54  ;;  %3931 = vst [vmem:[#allocation43_spill] sm:$0xff] %v2924_v3 }
 0x106   :  { %v219_v2 = vpop.f32.mrf.mxu0  ;;  %v332_v62 = vpop.f32.mrf.mxu1 }
 0x107   :  { %v2926_v53 = vadd.f32 %v219_v2, %v100_v63  ;;  %v2929_v58 = vadd.f32 %v332_v62, %v2872_v4 }
 0x108   :  { %v221_v57 = vpop.f32.mrf.mxu0  ;;  %v334_v55 = vpop.f32.mrf.mxu1 }
 0x109   :  { %3932 = vst [vmem:[#allocation44_spill] sm:$0xff] %v2926_v53  ;;  %3933 = vst [vmem:[#allocation45_spill] sm:$0xff] %v2929_v58  ;;  %v2931_v56 = vadd.f32 %v221_v57, %v104_v61  ;;  %v2934_v52 = vadd.f32 %v334_v55, %v2874_v60  ;;  %v184_v57 = vadd.f32 %v2861_v11, %v100_v63 }
 0x10a   :  { %v186_v55 = vadd.f32 %v2868_v0, %v104_v61 }
 0x10b   :  { %3934 = vst [vmem:[#allocation46_spill] sm:$0xff] %v2931_v56  ;;  %3935 = vst [vmem:[#allocation47_spill] sm:$0xff] %v2934_v52 }
 0x10c   :  { %v225_v29 = vpop.f32.mrf.mxu0  ;;  %v338_v47 = vpop.f32.mrf.mxu1 }
 0x10d   :  { %v2936_v54 = vadd.f32 %v225_v29, %v100_v63  ;;  %v2939_v20 = vadd.f32 %v338_v47, %v2872_v4 }
 0x10e   :  { %v227_v3 = vpop.f32.mrf.mxu0  ;;  %v340_v2 = vpop.f32.mrf.mxu1 }
 0x10f   :  { %3936 = vst [vmem:[#allocation48_spill] sm:$0xff] %v2936_v54  ;;  %3937 = vst [vmem:[#allocation49_spill] sm:$0xff] %v2939_v20  ;;  %v2941_v53 = vadd.f32 %v227_v3, %v104_v61  ;;  %v2944_v62 = vadd.f32 %v340_v2, %v2874_v60  ;;  %v299_v3 = vadd.f32 %v2870_v1, %v2874_v60 }
 0x110   :  { %v297_v2 = vadd.f32 %v2863_v38, %v2872_v4 }
 0x111   :  { %3938 = vst [vmem:[#allocation50_spill] sm:$0xff] %v2941_v53  ;;  %3939 = vst [vmem:[#allocation51_spill] sm:$0xff] %v2944_v62 }
 0x112   :  { %v473_v58 = vpop.f32.mrf.mxu0  ;;  %v544_v54 = vpop.f32.mrf.mxu1 }
 0x113   :  { %v549_v52 = vadd.f32 %v473_v58, %v184_v57  ;;  %v551_v62 = vadd.f32 %v544_v54, %v297_v2  ;;  %v3940_v54 = vld [vmem:[#allocation4_spill] sm:$0xff]  ;;  %v3945_v2 = vld [vmem:[#allocation9_spill] sm:$0xff] }
 0x114   :  { %v475_v56 = vpop.f32.mrf.mxu0  ;;  %v546_v20 = vpop.f32.mrf.mxu1 }
 0x115   :  { %v1865_v59 = vmul.f32 -1.442695, %v549_v52  ;;  %v550_v29 = vadd.f32 %v475_v56, %v186_v55  ;;  %v552_v53 = vadd.f32 %v546_v20, %v299_v3  ;;  %v3944_v3 = vld [vmem:[#allocation8_spill] sm:$0xff] }
 0x117   :  { %1944 = vpow2.f32 %v1865_v59  ;;  %v1866_v47 = vmul.f32 -1.442695, %v550_v29  ;;  %v1867_v63 = vmul.f32 -1.442695, %v552_v53  ;;  %v3942_v29 = vld [vmem:[#allocation6_spill] sm:$0xff] }
 0x119   :  { %1946 = vpow2.f32 %v1866_v47  ;;  %v3943_v47 = vld [vmem:[#allocation7_spill] sm:$0xff] }
 0x11a   :  { %1948 = vpow2.f32 %v1867_v63  ;;  %v3946_v63 = vld [vmem:[#allocation10_spill] sm:$0xff] }
 0x124   :  { %v1945_v11 = vpop.eup %1944 }
 0x125   :  { %v556_v61 = vadd.f32 1.0, %v1945_v11  ;;  %v3947_v11 = vld [vmem:[#allocation11_spill] sm:$0xff] }
 0x126   :  { %v1947_v0 = vpop.eup %1946 }
 0x127   :  { %1950 = vrcp.f32 %v556_v61  ;;  %v562_v56 = vadd.f32 1.0, %v1947_v0  ;;  %v1949_v59 = vpop.eup %1948  ;;  %v3948_v61 = vld [vmem:[#allocation12_spill] sm:$0xff]  ;;  %v3949_v0 = vld [vmem:[#allocation13_spill] sm:$0xff] }
 0x128   :  { %1952 = vtanh.f32 %v551_v62  ;;  %v569_v55 = vadd.f32 1.0, %v1949_v59  ;;  %v3941_v62 = vld [vmem:[#allocation5_spill] sm:$0xff]  ;;  %v3951_v59 = vld [vmem:[#allocation15_spill] sm:$0xff] }
 0x129   :  { %1954 = vrcp.f32 %v562_v56  ;;  %v3950_v56 = vld [vmem:[#allocation14_spill] sm:$0xff] }
 0x12a   :  { %1956 = vrcp.f32 %v569_v55  ;;  %v3955_v55 = vld [vmem:[#allocation19_spill] sm:$0xff] }
 0x134   :  { %v1951_v58 = vpop.eup %1950 }
 0x135   :  { %v1953_v52 = vpop.eup %1952 }
 0x136   :  { %v1955_v57 = vpop.eup %1954  ;;  %v573_v1 = vmul.f32 %v1953_v52, %v1951_v58  ;;  %v3952_v58 = vld [vmem:[#allocation16_spill] sm:$0xff]  ;;  %v3953_v52 = vld [vmem:[#allocation17_spill] sm:$0xff] }
 0x137   :  { %v572_v60 = vmul.f32 0.0, %v1955_v57  ;;  %v1957_v4 = vpop.eup %1956  ;;  %v3954_v57 = vld [vmem:[#allocation18_spill] sm:$0xff] }
 0x139   :  { %v2952_v20 = vadd.f32 %v573_v1, %v572_v60  ;;  %v3956_v60 = vld [vmem:[#allocation20_spill] sm:$0xff]  ;;  %v3957_v1 = vld [vmem:[#allocation21_spill] sm:$0xff] }
 0x13b   :  { %1958 = vtanh.f32 %v2952_v20 }
 0x148   :  { %v1959_v53 = vpop.eup %1958 }
 0x149   :  { %v576_v38 = vmul.f32 %v1959_v53, %v1957_v4  ;;  %v3958_v4 = vld [vmem:[#allocation22_spill] sm:$0xff]  ;;  %v3959_v53 = vmov 0.0  }
 0x14b   :  { %642 = vmatmul.mubr.f32.vlgmr.msra.gmra.mxu0 %v576_v38  ;;  %713 = vmatmul.mubr.f32.vlgmr.msra.gmra.mxu1 %v576_v38  ;;  %v3960_v38 = vld [vmem:[#allocation23_spill] sm:$0xff] }
 0x14c   :  { %748 = vmatpush1.msra.mxu0 %v2383_v5  ;;  %819 = vmatpush1.msra.mxu1 %v2388_v6 }
 0x14d   :  { %749 = vmatprep.subr.mxu0 %v2393_v7  ;;  %820 = vmatprep.subr.mxu1 %v2398_v8 }
 0x14e   :  { %750 = vmatpush1.msra.mxu0 %v2407_v9  ;;  %821 = vmatpush1.msra.mxu1 %v2412_v10 }
 0x14f   :  { %751 = vmatprep.subr.mxu0 %v2424_v12  ;;  %822 = vmatprep.subr.mxu1 %v2429_v13 }
 0x150   :  { %752 = vmatpush1.msra.mxu0 %v2436_v14  ;;  %823 = vmatpush1.msra.mxu1 %v2441_v15 }
 0x151   :  { %753 = vmatprep.subr.mxu0 %v2446_v16  ;;  %824 = vmatprep.subr.mxu1 %v2451_v17 }
 0x152   :  { %754 = vmatpush1.msra.mxu0 %v2460_v18  ;;  %825 = vmatpush1.msra.mxu1 %v2465_v19 }
 0x153   :  { %755 = vmatprep.subr.mxu0 %v2477_v21  ;;  %826 = vmatprep.subr.mxu1 %v2482_v22 }
 0x154   :  { %756 = vmatpush1.msra.mxu0 %v2489_v23  ;;  %827 = vmatpush1.msra.mxu1 %v2494_v24 }
 0x155   :  { %757 = vmatprep.subr.mxu0 %v2499_v25  ;;  %828 = vmatprep.subr.mxu1 %v2504_v26 }
 0x156   :  { %758 = vmatpush1.msra.mxu0 %v2513_v27  ;;  %829 = vmatpush1.msra.mxu1 %v2518_v28 }
 0x157   :  { %759 = vmatprep.subr.mxu0 %v2530_v30  ;;  %830 = vmatprep.subr.mxu1 %v2535_v31 }
 0x158   :  { %760 = vmatpush1.msra.mxu0 %v2542_v32  ;;  %831 = vmatpush1.msra.mxu1 %v2547_v33 }
 0x159   :  { %761 = vmatprep.subr.mxu0 %v2552_v34  ;;  %832 = vmatprep.subr.mxu1 %v2557_v35 }
 0x15a   :  { %762 = vmatpush1.msra.mxu0 %v2566_v36  ;;  %833 = vmatpush1.msra.mxu1 %v2571_v37 }
 0x15b   :  { %763 = vmatprep.subr.mxu0 %v2583_v39  ;;  %834 = vmatprep.subr.mxu1 %v2588_v40 }
 0x15c   :  { %764 = vmatpush1.msra.mxu0 %v2595_v41  ;;  %835 = vmatpush1.msra.mxu1 %v2600_v42 }
 0x15d   :  { %765 = vmatprep.subr.mxu0 %v2605_v43  ;;  %836 = vmatprep.subr.mxu1 %v2610_v44 }
 0x15e   :  { %766 = vmatpush1.msra.mxu0 %v2619_v45  ;;  %837 = vmatpush1.msra.mxu1 %v2624_v46 }
 0x15f   :  { %767 = vmatprep.subr.mxu0 %v2636_v48  ;;  %838 = vmatprep.subr.mxu1 %v2641_v49 }
 0x160   :  { %768 = vmatpush1.msra.mxu0 %v2648_v50  ;;  %839 = vmatpush1.msra.mxu1 %v2653_v51 }
 0x161   :  { %769 = vmatprep.subr.mxu0 %v3940_v54  ;;  %840 = vmatprep.subr.mxu1 %v3941_v62 }
 0x162   :  { %770 = vmatpush1.msra.mxu0 %v3942_v29  ;;  %841 = vmatpush1.msra.mxu1 %v3943_v47 }
 0x163   :  { %771 = vmatprep.subr.mxu0 %v3944_v3  ;;  %842 = vmatprep.subr.mxu1 %v3945_v2  ;;  %v3966_v2 = vld [vmem:[#allocation25_spill] sm:$0xff] }
 0x164   :  { %772 = vmatpush1.msra.mxu0 %v3946_v63  ;;  %843 = vmatpush1.msra.mxu1 %v3947_v11  ;;  %v3965_v63 = vld [vmem:[#allocation27_spill] sm:$0xff] }
 0x165   :  { %773 = vmatprep.subr.mxu0 %v3948_v61  ;;  %844 = vmatprep.subr.mxu1 %v3949_v0 }
 0x166   :  { %774 = vmatpush1.msra.mxu0 %v3950_v56  ;;  %845 = vmatpush1.msra.mxu1 %v3951_v59  ;;  %v3961_v59 = vld [vmem:[#allocation2_spill] sm:$0xff] }
 0x167   :  { %775 = vmatprep.subr.mxu0 %v3952_v58  ;;  %846 = vmatprep.subr.mxu1 %v3953_v52  ;;  %v3962_v58 = vld [vmem:[#allocation3_spill] sm:$0xff] }
 0x168   :  { %776 = vmatpush1.msra.mxu0 %v3954_v57  ;;  %847 = vmatpush1.msra.mxu1 %v3955_v55  ;;  %v3963_v57 = vld [vmem:[#allocation24_spill] sm:$0xff] }
 0x169   :  { %777 = vmatprep.subr.mxu0 %v3956_v60  ;;  %848 = vmatprep.subr.mxu1 %v3957_v1  ;;  %v3964_v60 = vld [vmem:[#allocation26_spill] sm:$0xff] }
 0x16a   :  { %778 = vmatpush1.msra.mxu0 %v3958_v4  ;;  %811 = vmatprep.mubr.f32.mxu0 %v3959_v53 }
 0x16b   :  { %849 = vmatpush1.msra.mxu1 %v3960_v38  ;;  %882 = vmatprep.mubr.f32.mxu1 %v3959_v53 }
 0x16c   :  { %917 = vmatprep.subr.mxu0 %v3961_v59  ;;  %988 = vmatprep.subr.mxu1 %v3962_v58 }
 0x20b   :  { %v643_v52 = vpop.f32.mrf.mxu0  ;;  %v714_v1 = vpop.f32.mrf.mxu1 }
 0x20c   :  { %v719_v56 = vadd.f32 %v643_v52, %v3963_v57  ;;  %v721_v53 = vadd.f32 %v714_v1, %v3966_v2 }
 0x20d   :  { %v645_v55 = vpop.f32.mrf.mxu0  ;;  %v716_v11 = vpop.f32.mrf.mxu1 }
 0x20e   :  { %v1868_v0 = vmul.f32 -1.442695, %v719_v56  ;;  %v720_v61 = vadd.f32 %v645_v55, %v3964_v60  ;;  %v722_v38 = vadd.f32 %v716_v11, %v3965_v63 }
 0x210   :  { %1960 = vpow2.f32 %v1868_v0  ;;  %v1869_v4 = vmul.f32 -1.442695, %v720_v61  ;;  %v1870_v3 = vmul.f32 -1.442695, %v722_v38  ;;  %v3989_v38 = vld [vmem:[#allocation31_spill] sm:$0xff] }
 0x212   :  { %1962 = vpow2.f32 %v1869_v4 }
 0x213   :  { %1964 = vtanh.f32 %v721_v53 }
 0x214   :  { %1966 = vpow2.f32 %v1870_v3 }
 0x21d   :  { %v1961_v59 = vpop.eup %1960 }
 0x21e   :  { %v726_v47 = vadd.f32 1.0, %v1961_v59 }
 0x21f   :  { %v1963_v58 = vpop.eup %1962 }
 0x220   :  { %1968 = vrcp.f32 %v726_v47  ;;  %v732_v52 = vadd.f32 1.0, %v1963_v58  ;;  %v1965_v56 = vpop.eup %1964  ;;  %v3990_v58 = vld [vmem:[#allocation29_spill] sm:$0xff] }
 0x221   :  { %v1967_v57 = vpop.eup %1966 }
 0x222   :  { %1970 = vrcp.f32 %v732_v52  ;;  %v739_v60 = vadd.f32 1.0, %v1967_v57 }
 0x224   :  { %1972 = vrcp.f32 %v739_v60 }
 0x22d   :  { %v1969_v0 = vpop.eup %1968 }
 0x22e   :  { %v743_v55 = vmul.f32 %v1969_v0, %v1965_v56 }
 0x22f   :  { %v1971_v61 = vpop.eup %1970 }
 0x230   :  { %v742_v4 = vmul.f32 %v1971_v61, %v2952_v20 }
 0x231   :  { %v1973_v2 = vpop.eup %1972 }
 0x232   :  { %v3026_v63 = vadd.f32 %v743_v55, %v742_v4 }
 0x234   :  { %1974 = vtanh.f32 %v3026_v63 }
 0x241   :  { %v1975_v11 = vpop.eup %1974 }
 0x242   :  { %v746_v1 = vmul.f32 %v1975_v11, %v1973_v2 }
 0x244   :  { %812 = vmatmul.mubr.f32.vlgmr.msra.gmra.mxu0 %v746_v1  ;;  %883 = vmatmul.mubr.f32.vlgmr.msra.gmra.mxu1 %v746_v1 }
 0x245   :  { %918 = vmatpush1.msra.mxu0 %v2383_v5  ;;  %989 = vmatpush1.msra.mxu1 %v2388_v6  ;;  %v3967_v5 = vld [vmem:[#allocation7_spill] sm:$0xff]  ;;  %v3968_v6 = vld [vmem:[#allocation8_spill] sm:$0xff] }
 0x246   :  { %919 = vmatprep.subr.mxu0 %v2393_v7  ;;  %990 = vmatprep.subr.mxu1 %v2398_v8  ;;  %v3969_v7 = vld [vmem:[#allocation9_spill] sm:$0xff]  ;;  %v3970_v8 = vld [vmem:[#allocation10_spill] sm:$0xff] }
 0x247   :  { %920 = vmatpush1.msra.mxu0 %v2407_v9  ;;  %991 = vmatpush1.msra.mxu1 %v2412_v10  ;;  %v3971_v9 = vld [vmem:[#allocation11_spill] sm:$0xff]  ;;  %v3972_v10 = vld [vmem:[#allocation12_spill] sm:$0xff] }
 0x248   :  { %921 = vmatprep.subr.mxu0 %v2424_v12  ;;  %992 = vmatprep.subr.mxu1 %v2429_v13  ;;  %v3973_v12 = vld [vmem:[#allocation13_spill] sm:$0xff]  ;;  %v3974_v13 = vld [vmem:[#allocation14_spill] sm:$0xff] }
 0x249   :  { %922 = vmatpush1.msra.mxu0 %v2436_v14  ;;  %993 = vmatpush1.msra.mxu1 %v2441_v15  ;;  %v3975_v14 = vld [vmem:[#allocation15_spill] sm:$0xff]  ;;  %v3976_v15 = vld [vmem:[#allocation16_spill] sm:$0xff] }
 0x24a   :  { %923 = vmatprep.subr.mxu0 %v2446_v16  ;;  %994 = vmatprep.subr.mxu1 %v2451_v17  ;;  %v3977_v16 = vld [vmem:[#allocation17_spill] sm:$0xff]  ;;  %v3978_v17 = vld [vmem:[#allocation18_spill] sm:$0xff] }
 0x24b   :  { %924 = vmatpush1.msra.mxu0 %v2460_v18  ;;  %995 = vmatpush1.msra.mxu1 %v2465_v19  ;;  %v3979_v18 = vld [vmem:[#allocation19_spill] sm:$0xff]  ;;  %v3980_v19 = vld [vmem:[#allocation20_spill] sm:$0xff] }
 0x24c   :  { %925 = vmatprep.subr.mxu0 %v2477_v21  ;;  %996 = vmatprep.subr.mxu1 %v2482_v22  ;;  %v3981_v21 = vld [vmem:[#allocation21_spill] sm:$0xff]  ;;  %v3982_v22 = vld [vmem:[#allocation22_spill] sm:$0xff] }
 0x24d   :  { %926 = vmatpush1.msra.mxu0 %v2489_v23  ;;  %997 = vmatpush1.msra.mxu1 %v2494_v24  ;;  %v3983_v23 = vmov 0.0   ;;  %v3984_v24 = vld [vmem:[#allocation23_spill] sm:$0xff] }
 0x24e   :  { %927 = vmatprep.subr.mxu0 %v2499_v25  ;;  %998 = vmatprep.subr.mxu1 %v2504_v26  ;;  %v3096_v25 = vld [vmem:[%s3795_s2 + $0x1e8] sm:$0xff]  ;;  %v3102_v26 = vld [vmem:[%s3795_s2 + $0x1f8] sm:$0xff] }
 0x24f   :  { %928 = vmatpush1.msra.mxu0 %v2513_v27  ;;  %999 = vmatpush1.msra.mxu1 %v2518_v28  ;;  %3985 = vst [vmem:[#allocation4_spill] sm:$0xff] %v3096_v25  ;;  %3986 = vst [vmem:[#allocation5_spill] sm:$0xff] %v3102_v26  ;;  %v3987_v28 = vld [vmem:[#allocation28_spill] sm:$0xff] }
 0x250   :  { %929 = vmatprep.subr.mxu0 %v2530_v30  ;;  %1000 = vmatprep.subr.mxu1 %v2535_v31 }
 0x251   :  { %930 = vmatpush1.msra.mxu0 %v2542_v32  ;;  %1001 = vmatpush1.msra.mxu1 %v2547_v33  ;;  %v3988_v33 = vld [vmem:[#allocation30_spill] sm:$0xff] }
 0x252   :  { %931 = vmatprep.subr.mxu0 %v2552_v34  ;;  %1002 = vmatprep.subr.mxu1 %v2557_v35 }
 0x253   :  { %932 = vmatpush1.msra.mxu0 %v2566_v36  ;;  %1003 = vmatpush1.msra.mxu1 %v2571_v37 }
 0x254   :  { %933 = vmatprep.subr.mxu0 %v2583_v39  ;;  %1004 = vmatprep.subr.mxu1 %v2588_v40 }
 0x255   :  { %934 = vmatpush1.msra.mxu0 %v2595_v41  ;;  %1005 = vmatpush1.msra.mxu1 %v2600_v42 }
 0x256   :  { %935 = vmatprep.subr.mxu0 %v2605_v43  ;;  %1006 = vmatprep.subr.mxu1 %v2610_v44 }
 0x257   :  { %936 = vmatpush1.msra.mxu0 %v2619_v45  ;;  %1007 = vmatpush1.msra.mxu1 %v2624_v46 }
 0x258   :  { %937 = vmatprep.subr.mxu0 %v2636_v48  ;;  %1008 = vmatprep.subr.mxu1 %v2641_v49 }
 0x259   :  { %938 = vmatpush1.msra.mxu0 %v2648_v50  ;;  %1009 = vmatpush1.msra.mxu1 %v2653_v51 }
 0x25a   :  { %939 = vmatprep.subr.mxu0 %v3940_v54  ;;  %1010 = vmatprep.subr.mxu1 %v3941_v62 }
 0x25b   :  { %940 = vmatpush1.msra.mxu0 %v3942_v29  ;;  %1011 = vmatpush1.msra.mxu1 %v3967_v5 }
 0x25c   :  { %941 = vmatprep.subr.mxu0 %v3968_v6  ;;  %1012 = vmatprep.subr.mxu1 %v3969_v7 }
 0x25d   :  { %942 = vmatpush1.msra.mxu0 %v3970_v8  ;;  %1013 = vmatpush1.msra.mxu1 %v3971_v9 }
 0x25e   :  { %943 = vmatprep.subr.mxu0 %v3972_v10  ;;  %1014 = vmatprep.subr.mxu1 %v3973_v12 }
 0x25f   :  { %944 = vmatpush1.msra.mxu0 %v3974_v13  ;;  %1015 = vmatpush1.msra.mxu1 %v3975_v14 }
 0x260   :  { %945 = vmatprep.subr.mxu0 %v3976_v15  ;;  %1016 = vmatprep.subr.mxu1 %v3977_v16 }
 0x261   :  { %946 = vmatpush1.msra.mxu0 %v3978_v17  ;;  %1017 = vmatpush1.msra.mxu1 %v3979_v18 }
 0x262   :  { %947 = vmatprep.subr.mxu0 %v3980_v19  ;;  %1018 = vmatprep.subr.mxu1 %v3981_v21 }
 0x263   :  { %948 = vmatpush1.msra.mxu0 %v3982_v22  ;;  %981 = vmatprep.mubr.f32.mxu0 %v3983_v23 }
 0x264   :  { %1019 = vmatpush1.msra.mxu1 %v3984_v24  ;;  %1052 = vmatprep.mubr.f32.mxu1 %v3983_v23 }
 0x265   :  { %1087 = vmatprep.subr.mxu0 %v3096_v25  ;;  %1158 = vmatprep.subr.mxu1 %v3102_v26 }
 0x304   :  { %v813_v27 = vpop.f32.mrf.mxu0  ;;  %v884_v47 = vpop.f32.mrf.mxu1 }
 0x305   :  { %v889_v30 = vadd.f32 %v813_v27, %v3987_v28  ;;  %v891_v52 = vadd.f32 %v884_v47, %v3990_v58  ;;  %v3128_v47 = vld [vmem:[%s3795_s2 + $0x1c8] sm:$0xff]  ;;  %v3158_v58 = vld [vmem:[%s3795_s2 + $0x1b8] sm:$0xff] }
 0x306   :  { %v815_v31 = vpop.f32.mrf.mxu0  ;;  %v886_v53 = vpop.f32.mrf.mxu1 }
 0x307   :  { %v1871_v32 = vmul.f32 -1.442695, %v889_v30  ;;  %v890_v20 = vadd.f32 %v815_v31, %v3988_v33  ;;  %v892_v59 = vadd.f32 %v886_v53, %v3989_v38  ;;  %v3140_v53 = vld [vmem:[%s3795_s2 + $0x1c0] sm:$0xff]  ;;  %v3146_v38 = vld [vmem:[%s3795_s2 + $0x1d0] sm:$0xff] }
 0x309   :  { %1976 = vpow2.f32 %v1871_v32  ;;  %v1872_v3 = vmul.f32 -1.442695, %v890_v20  ;;  %v1873_v56 = vmul.f32 -1.442695, %v892_v59  ;;  %v3116_v20 = vld [vmem:[%s3795_s2 + $0x1e0] sm:$0xff]  ;;  %v3152_v59 = vld [vmem:[%s3795_s2 + $0x1a8] sm:$0xff] }
 0x30b   :  { %1978 = vpow2.f32 %v1872_v3  ;;  %v3134_v3 = vld [vmem:[%s3795_s2 + $0x1d8] sm:$0xff] }
 0x30c   :  { %1980 = vtanh.f32 %v891_v52  ;;  %v3164_v52 = vld [vmem:[%s3795_s2 + $0x1a0] sm:$0xff] }
 0x30d   :  { %1982 = vpow2.f32 %v1873_v56  ;;  %v3170_v56 = vld [vmem:[%s3795_s2 + $0x1b0] sm:$0xff] }
 0x316   :  { %v1977_v57 = vpop.eup %1976 }
 0x317   :  { %v896_v0 = vadd.f32 1.0, %v1977_v57  ;;  %v3176_v57 = vld [vmem:[%s3795_s2 + $0x188] sm:$0xff] }
 0x318   :  { %v1979_v55 = vpop.eup %1978 }
 0x319   :  { %1984 = vrcp.f32 %v896_v0  ;;  %v902_v61 = vadd.f32 1.0, %v1979_v55  ;;  %v1981_v60 = vpop.eup %1980  ;;  %v3182_v0 = vld [vmem:[%s3795_s2 + $0x198] sm:$0xff]  ;;  %v3188_v55 = vld [vmem:[%s3795_s2 + $0x180] sm:$0xff] }
 0x31a   :  { %v1983_v4 = vpop.eup %1982 }
 0x31b   :  { %1986 = vrcp.f32 %v902_v61  ;;  %v909_v27 = vadd.f32 1.0, %v1983_v4  ;;  %v3194_v61 = vld [vmem:[%s3795_s2 + $0x190] sm:$0xff]  ;;  %v3206_v4 = vld [vmem:[%s3795_s2 + $0x178] sm:$0xff] }
 0x31d   :  { %1988 = vrcp.f32 %v909_v27  ;;  %v3230_v27 = vld [vmem:[%s3795_s2 + $0x158] sm:$0xff] }
 0x326   :  { %v1985_v2 = vpop.eup %1984 }
 0x327   :  { %v913_v11 = vmul.f32 %v1985_v2, %v1981_v60  ;;  %v3200_v60 = vld [vmem:[%s3795_s2 + $0x168] sm:$0xff]  ;;  %v3212_v2 = vld [vmem:[%s3795_s2 + $0x160] sm:$0xff] }
 0x328   :  { %v1987_v1 = vpop.eup %1986 }
 0x329   :  { %v912_v28 = vmul.f32 %v1987_v1, %v3026_v63  ;;  %v3122_v63 = vld [vmem:[%s3795_s2 + $0x1f0] sm:$0xff]  ;;  %v3224_v1 = vld [vmem:[%s3795_s2 + $0x148] sm:$0xff] }
 0x32a   :  { %v1989_v31 = vpop.eup %1988 }
 0x32b   :  { %v3110_v30 = vadd.f32 %v913_v11, %v912_v28  ;;  %v3218_v11 = vld [vmem:[%s3795_s2 + $0x170] sm:$0xff]  ;;  %v3236_v28 = vld [vmem:[%s3795_s2 + $0x140] sm:$0xff] }
 0x32c   :  { %3991 = vst [vmem:[#allocation6_spill] sm:$0xff] %v3236_v28 }
 0x32d   :  { %1990 = vtanh.f32 %v3110_v30 }
 0x33a   :  { %v1991_v32 = vpop.eup %1990 }
 0x33b   :  { %v916_v33 = vmul.f32 %v1991_v32, %v1989_v31  ;;  %v3242_v31 = vld [vmem:[%s3795_s2 + $0x150] sm:$0xff]  ;;  %v3248_v32 = vld [vmem:[%s3795_s2 + $0x128] sm:$0xff] }
 0x33c   :  { %3992 = vst [vmem:[#allocation2_spill] sm:$0xff] %v3242_v31 }
 0x33d   :  { %982 = vmatmul.mubr.f32.vlgmr.msra.gmra.mxu0 %v916_v33  ;;  %1053 = vmatmul.mubr.f32.vlgmr.msra.gmra.mxu1 %v916_v33  ;;  %v3254_v33 = vld [vmem:[%s3795_s2 + $0x138] sm:$0xff] }
 0x33e   :  { %1088 = vmatpush1.msra.mxu0 %v3116_v20  ;;  %1159 = vmatpush1.msra.mxu1 %v3122_v63 }
 0x33f   :  { %1089 = vmatprep.subr.mxu0 %v3128_v47  ;;  %1160 = vmatprep.subr.mxu1 %v3134_v3 }
 0x340   :  { %1090 = vmatpush1.msra.mxu0 %v3140_v53  ;;  %1161 = vmatpush1.msra.mxu1 %v3146_v38 }
 0x341   :  { %1091 = vmatprep.subr.mxu0 %v3152_v59  ;;  %1162 = vmatprep.subr.mxu1 %v3158_v58 }
 0x342   :  { %1092 = vmatpush1.msra.mxu0 %v3164_v52  ;;  %1163 = vmatpush1.msra.mxu1 %v3170_v56 }
 0x343   :  { %1093 = vmatprep.subr.mxu0 %v3176_v57  ;;  %1164 = vmatprep.subr.mxu1 %v3182_v0 }
 0x344   :  { %1094 = vmatpush1.msra.mxu0 %v3188_v55  ;;  %1165 = vmatpush1.msra.mxu1 %v3194_v61 }
 0x345   :  { %1095 = vmatprep.subr.mxu0 %v3200_v60  ;;  %1166 = vmatprep.subr.mxu1 %v3206_v4 }
 0x346   :  { %1096 = vmatpush1.msra.mxu0 %v3212_v2  ;;  %1167 = vmatpush1.msra.mxu1 %v3218_v11 }
 0x347   :  { %1097 = vmatprep.subr.mxu0 %v3224_v1  ;;  %1168 = vmatprep.subr.mxu1 %v3230_v27 }
 0x348   :  { %1098 = vmatpush1.msra.mxu0 %v3236_v28  ;;  %1169 = vmatpush1.msra.mxu1 %v3242_v31  ;;  %v3260_v28 = vld [vmem:[%s3795_s2 + $0x120] sm:$0xff]  ;;  %v3266_v31 = vld [vmem:[%s3795_s2 + $0x130] sm:$0xff] }
 0x349   :  { %1099 = vmatprep.subr.mxu0 %v3248_v32  ;;  %1170 = vmatprep.subr.mxu1 %v3254_v33 }
 0x34a   :  { %1100 = vmatpush1.msra.mxu0 %v3260_v28  ;;  %1171 = vmatpush1.msra.mxu1 %v3266_v31 }
 0x34b   :  { %1101 = vmatprep.subr.mxu0 %v2552_v34  ;;  %1172 = vmatprep.subr.mxu1 %v2557_v35  ;;  %v3993_v35 = vld [vmem:[#allocation32_spill] sm:$0xff] }
 0x34c   :  { %1102 = vmatpush1.msra.mxu0 %v2566_v36  ;;  %1173 = vmatpush1.msra.mxu1 %v2571_v37 }
 0x34d   :  { %1103 = vmatprep.subr.mxu0 %v2583_v39  ;;  %1174 = vmatprep.subr.mxu1 %v2588_v40  ;;  %v3994_v40 = vld [vmem:[#allocation34_spill] sm:$0xff] }
 0x34e   :  { %1104 = vmatpush1.msra.mxu0 %v2595_v41  ;;  %1175 = vmatpush1.msra.mxu1 %v2600_v42 }
 0x34f   :  { %1105 = vmatprep.subr.mxu0 %v2605_v43  ;;  %1176 = vmatprep.subr.mxu1 %v2610_v44 }
 0x350   :  { %1106 = vmatpush1.msra.mxu0 %v2619_v45  ;;  %1177 = vmatpush1.msra.mxu1 %v2624_v46  ;;  %v3995_v45 = vld [vmem:[#allocation35_spill] sm:$0xff] }
 0x351   :  { %1107 = vmatprep.subr.mxu0 %v2636_v48  ;;  %1178 = vmatprep.subr.mxu1 %v2641_v49  ;;  %v3996_v48 = vld [vmem:[#allocation33_spill] sm:$0xff] }
 0x352   :  { %1108 = vmatpush1.msra.mxu0 %v2648_v50  ;;  %1179 = vmatpush1.msra.mxu1 %v2653_v51 }
 0x353   :  { %1109 = vmatprep.subr.mxu0 %v3940_v54  ;;  %1180 = vmatprep.subr.mxu1 %v3941_v62 }
 0x354   :  { %1110 = vmatpush1.msra.mxu0 %v3942_v29  ;;  %1181 = vmatpush1.msra.mxu1 %v3967_v5 }
 0x355   :  { %1111 = vmatprep.subr.mxu0 %v3968_v6  ;;  %1182 = vmatprep.subr.mxu1 %v3969_v7 }
 0x356   :  { %1112 = vmatpush1.msra.mxu0 %v3970_v8  ;;  %1183 = vmatpush1.msra.mxu1 %v3971_v9 }
 0x357   :  { %1113 = vmatprep.subr.mxu0 %v3972_v10  ;;  %1184 = vmatprep.subr.mxu1 %v3973_v12 }
 0x358   :  { %1114 = vmatpush1.msra.mxu0 %v3974_v13  ;;  %1185 = vmatpush1.msra.mxu1 %v3975_v14 }
 0x359   :  { %1115 = vmatprep.subr.mxu0 %v3976_v15  ;;  %1186 = vmatprep.subr.mxu1 %v3977_v16 }
 0x35a   :  { %1116 = vmatpush1.msra.mxu0 %v3978_v17  ;;  %1187 = vmatpush1.msra.mxu1 %v3979_v18  ;;  %v3997_v17 = vld [vmem:[#allocation6_spill] sm:$0xff] }
 0x35b   :  { %1117 = vmatprep.subr.mxu0 %v3980_v19  ;;  %1188 = vmatprep.subr.mxu1 %v3981_v21  ;;  %v3998_v18 = vld [vmem:[#allocation2_spill] sm:$0xff]  ;;  %v3346_v19 = vld [vmem:[%s3795_s2 + $0x108] sm:$0xff]  ;;  %v3352_v21 = vld [vmem:[%s3795_s2 + $0x118] sm:$0xff] }
 0x35c   :  { %1118 = vmatpush1.msra.mxu0 %v3982_v22  ;;  %1151 = vmatprep.mubr.f32.mxu0 %v3983_v23  ;;  %v3358_v22 = vld [vmem:[%s3795_s2 + $0x100] sm:$0xff] }
 0x35d   :  { %1189 = vmatpush1.msra.mxu1 %v3984_v24  ;;  %1222 = vmatprep.mubr.f32.mxu1 %v3983_v23  ;;  %v3364_v24 = vld [vmem:[%s3795_s2 + $0x110] sm:$0xff] }
 0x35e   :  { %1257 = vmatprep.subr.mxu0 %v3096_v25  ;;  %1328 = vmatprep.subr.mxu1 %v3102_v26 }
 0x3fd   :  { %v983_v34 = vpop.f32.mrf.mxu0  ;;  %v1054_v42 = vpop.f32.mrf.mxu1 }
 0x3fe   :  { %v1059_v36 = vadd.f32 %v983_v34, %v3993_v35  ;;  %v1061_v49 = vadd.f32 %v1054_v42, %v3996_v48  ;;  %v3376_v34 = vld [vmem:[%s3795_s2 + $0xf8] sm:$0xff]  ;;  %v3382_v35 = vld [vmem:[%s3795_s2 + $0xe0] sm:$0xff]  ;;  %v3418_v42 = vld [vmem:[%s3795_s2 + $0xa8] sm:$0xff] }
 0x3ff   :  { %v985_v37 = vpop.f32.mrf.mxu0  ;;  %v1056_v44 = vpop.f32.mrf.mxu1  ;;  %v3448_v48 = vld [vmem:[%s3795_s2 + $0x98] sm:$0xff] }
 0x400   :  { %v1874_v39 = vmul.f32 -1.442695, %v1059_v36  ;;  %v1060_v41 = vadd.f32 %v985_v37, %v3994_v40  ;;  %v1062_v46 = vadd.f32 %v1056_v44, %v3995_v45  ;;  %v3388_v36 = vld [vmem:[%s3795_s2 + $0xf0] sm:$0xff]  ;;  %v3394_v37 = vld [vmem:[%s3795_s2 + $0xc8] sm:$0xff]  ;;  %v3406_v40 = vld [vmem:[%s3795_s2 + $0xc0] sm:$0xff] }
 0x401   :  { %v3430_v44 = vld [vmem:[%s3795_s2 + $0xa0] sm:$0xff]  ;;  %v3436_v45 = vld [vmem:[%s3795_s2 + $0xb0] sm:$0xff] }
 0x402   :  { %1992 = vpow2.f32 %v1874_v39  ;;  %v1875_v43 = vmul.f32 -1.442695, %v1060_v41  ;;  %v1876_v50 = vmul.f32 -1.442695, %v1062_v46  ;;  %v3400_v39 = vld [vmem:[%s3795_s2 + $0xd8] sm:$0xff]  ;;  %v3412_v41 = vld [vmem:[%s3795_s2 + $0xd0] sm:$0xff] }
 0x403   :  { %v3442_v46 = vld [vmem:[%s3795_s2 + $0x88] sm:$0xff] }
 0x404   :  { %1994 = vpow2.f32 %v1875_v43  ;;  %v3424_v43 = vld [vmem:[%s3795_s2 + $0xb8] sm:$0xff] }
 0x405   :  { %1996 = vtanh.f32 %v1061_v49  ;;  %v3454_v49 = vld [vmem:[%s3795_s2 + $0x80] sm:$0xff] }
 0x406   :  { %1998 = vpow2.f32 %v1876_v50  ;;  %v3460_v50 = vld [vmem:[%s3795_s2 + $0x90] sm:$0xff] }
 0x407   :  { %3999 = vst [vmem:[#allocation3_spill] sm:$0xff] %v3460_v50 }
 0x40f   :  { %v1993_v51 = vpop.eup %1992 }
 0x410   :  { %v1066_v54 = vadd.f32 1.0, %v1993_v51  ;;  %v3466_v51 = vld [vmem:[%s3795_s2 + $0x68] sm:$0xff] }
 0x411   :  { %v1995_v62 = vpop.eup %1994  ;;  %4000 = vst [vmem:[#allocation24_spill] sm:$0xff] %v3466_v51 }
 0x412   :  { %2000 = vrcp.f32 %v1066_v54  ;;  %v1072_v29 = vadd.f32 1.0, %v1995_v62  ;;  %v1997_v5 = vpop.eup %1996  ;;  %v3472_v54 = vld [vmem:[%s3795_s2 + $0x78] sm:$0xff]  ;;  %v3478_v62 = vld [vmem:[%s3795_s2 + $0x60] sm:$0xff] }
 0x413   :  { %v1999_v6 = vpop.eup %1998  ;;  %4001 = vst [vmem:[#allocation26_spill] sm:$0xff] %v3472_v54  ;;  %4002 = vst [vmem:[#allocation27_spill] sm:$0xff] %v3478_v62 }
 0x414   :  { %2002 = vrcp.f32 %v1072_v29  ;;  %v1079_v10 = vadd.f32 1.0, %v1999_v6  ;;  %v3484_v29 = vld [vmem:[%s3795_s2 + $0x70] sm:$0xff]  ;;  %v3496_v6 = vld [vmem:[%s3795_s2 + $0x58] sm:$0xff] }
 0x415   :  { %4003 = vst [vmem:[#allocation25_spill] sm:$0xff] %v3484_v29  ;;  %4005 = vst [vmem:[#allocation8_spill] sm:$0xff] %v3496_v6 }
 0x416   :  { %2004 = vrcp.f32 %v1079_v10  ;;  %v3520_v10 = vld [vmem:[%s3795_s2 + $0x38] sm:$0xff] }
 0x417   :  { %4009 = vst [vmem:[#allocation12_spill] sm:$0xff] %v3520_v10 }
 0x41f   :  { %v2001_v7 = vpop.eup %2000 }
 0x420   :  { %v1083_v8 = vmul.f32 %v2001_v7, %v1997_v5  ;;  %v3490_v5 = vld [vmem:[%s3795_s2 + $0x48] sm:$0xff]  ;;  %v3502_v7 = vld [vmem:[%s3795_s2 + $0x40] sm:$0xff] }
 0x421   :  { %v2003_v9 = vpop.eup %2002  ;;  %4004 = vst [vmem:[#allocation7_spill] sm:$0xff] %v3490_v5  ;;  %4006 = vst [vmem:[#allocation9_spill] sm:$0xff] %v3502_v7 }
 0x422   :  { %v1082_v12 = vmul.f32 %v2003_v9, %v3110_v30  ;;  %v3370_v30 = vld [vmem:[%s3795_s2 + $0xe8] sm:$0xff] }
 0x423   :  { %v2005_v14 = vpop.eup %2004  ;;  %v3514_v9 = vld [vmem:[%s3795_s2 + $0x28] sm:$0xff] }
 0x424   :  { %v3314_v13 = vadd.f32 %v1083_v8, %v1082_v12  ;;  %v3508_v8 = vld [vmem:[%s3795_s2 + $0x50] sm:$0xff]  ;;  %4008 = vst [vmem:[#allocation11_spill] sm:$0xff] %v3514_v9  ;;  %v3526_v12 = vld [vmem:[%s3795_s2 + $0x20] sm:$0xff] }
 0x425   :  { %4007 = vst [vmem:[#allocation10_spill] sm:$0xff] %v3508_v8  ;;  %4010 = vst [vmem:[#allocation13_spill] sm:$0xff] %v3526_v12 }
 0x426   :  { %2006 = vtanh.f32 %v3314_v13 }
 0x433   :  { %v2007_v15 = vpop.eup %2006 }
 0x434   :  { %v1086_v16 = vmul.f32 %v2007_v15, %v2005_v14  ;;  %v3532_v14 = vld [vmem:[%s3795_s2 + $0x30] sm:$0xff]  ;;  %v3538_v15 = vld [vmem:[%s3795_s2 + $0x8] sm:$0xff] }
 0x435   :  { %4011 = vst [vmem:[#allocation14_spill] sm:$0xff] %v3532_v14  ;;  %4012 = vst [vmem:[#allocation15_spill] sm:$0xff] %v3538_v15 }
 0x436   :  { %1152 = vmatmul.mubr.f32.vlgmr.msra.gmra.mxu0 %v1086_v16  ;;  %1223 = vmatmul.mubr.f32.vlgmr.msra.gmra.mxu1 %v1086_v16  ;;  %v3544_v16 = vld [vmem:[%s3795_s2 + $0x18] sm:$0xff] }
 0x437   :  { %1258 = vmatpush1.msra.mxu0 %v3116_v20  ;;  %1329 = vmatpush1.msra.mxu1 %v3122_v63  ;;  %4013 = vst [vmem:[#allocation16_spill] sm:$0xff] %v3544_v16 }
 0x438   :  { %1259 = vmatprep.subr.mxu0 %v3128_v47  ;;  %1330 = vmatprep.subr.mxu1 %v3134_v3 }
 0x439   :  { %1260 = vmatpush1.msra.mxu0 %v3140_v53  ;;  %1331 = vmatpush1.msra.mxu1 %v3146_v38 }
 0x43a   :  { %1261 = vmatprep.subr.mxu0 %v3152_v59  ;;  %1332 = vmatprep.subr.mxu1 %v3158_v58 }
 0x43b   :  { %1262 = vmatpush1.msra.mxu0 %v3164_v52  ;;  %1333 = vmatpush1.msra.mxu1 %v3170_v56 }
 0x43c   :  { %1263 = vmatprep.subr.mxu0 %v3176_v57  ;;  %1334 = vmatprep.subr.mxu1 %v3182_v0 }
 0x43d   :  { %1264 = vmatpush1.msra.mxu0 %v3188_v55  ;;  %1335 = vmatpush1.msra.mxu1 %v3194_v61 }
 0x43e   :  { %1265 = vmatprep.subr.mxu0 %v3200_v60  ;;  %1336 = vmatprep.subr.mxu1 %v3206_v4 }
 0x43f   :  { %1266 = vmatpush1.msra.mxu0 %v3212_v2  ;;  %1337 = vmatpush1.msra.mxu1 %v3218_v11 }
 0x440   :  { %1267 = vmatprep.subr.mxu0 %v3224_v1  ;;  %1338 = vmatprep.subr.mxu1 %v3230_v27 }
 0x441   :  { %1268 = vmatpush1.msra.mxu0 %v3997_v17  ;;  %1339 = vmatpush1.msra.mxu1 %v3998_v18 }
 0x442   :  { %1269 = vmatprep.subr.mxu0 %v3248_v32  ;;  %1340 = vmatprep.subr.mxu1 %v3254_v33 }
 0x443   :  { %1270 = vmatpush1.msra.mxu0 %v3260_v28  ;;  %1341 = vmatpush1.msra.mxu1 %v3266_v31 }
 0x444   :  { %1271 = vmatprep.subr.mxu0 %v3346_v19  ;;  %1342 = vmatprep.subr.mxu1 %v3352_v21 }
 0x445   :  { %1272 = vmatpush1.msra.mxu0 %v3358_v22  ;;  %1343 = vmatpush1.msra.mxu1 %v3364_v24 }
 0x446   :  { %1273 = vmatprep.subr.mxu0 %v3370_v30  ;;  %1344 = vmatprep.subr.mxu1 %v3376_v34 }
 0x447   :  { %1274 = vmatpush1.msra.mxu0 %v3382_v35  ;;  %1345 = vmatpush1.msra.mxu1 %v3388_v36 }
 0x448   :  { %1275 = vmatprep.subr.mxu0 %v3394_v37  ;;  %1346 = vmatprep.subr.mxu1 %v3400_v39 }
 0x449   :  { %1276 = vmatpush1.msra.mxu0 %v3406_v40  ;;  %1347 = vmatpush1.msra.mxu1 %v3412_v41 }
 0x44a   :  { %1277 = vmatprep.subr.mxu0 %v3418_v42  ;;  %1348 = vmatprep.subr.mxu1 %v3424_v43 }
 0x44b   :  { %1278 = vmatpush1.msra.mxu0 %v3430_v44  ;;  %1349 = vmatpush1.msra.mxu1 %v3436_v45 }
 0x44c   :  { %1279 = vmatprep.subr.mxu0 %v3442_v46  ;;  %1350 = vmatprep.subr.mxu1 %v3448_v48 }
 0x44d   :  { %1280 = vmatpush1.msra.mxu0 %v3454_v49  ;;  %1351 = vmatpush1.msra.mxu1 %v3460_v50 }
 0x44e   :  { %1281 = vmatprep.subr.mxu0 %v3466_v51  ;;  %1352 = vmatprep.subr.mxu1 %v3472_v54  ;;  %v4019_v54 = vld [vmem:[#allocation37_spill] sm:$0xff] }
 0x44f   :  { %1282 = vmatpush1.msra.mxu0 %v3478_v62  ;;  %1353 = vmatpush1.msra.mxu1 %v3484_v29  ;;  %v4018_v62 = vld [vmem:[#allocation39_spill] sm:$0xff] }
 0x450   :  { %1283 = vmatprep.subr.mxu0 %v3490_v5  ;;  %1354 = vmatprep.subr.mxu1 %v3496_v6 }
 0x451   :  { %1284 = vmatpush1.msra.mxu0 %v3502_v7  ;;  %1355 = vmatpush1.msra.mxu1 %v3508_v8  ;;  %v4017_v8 = vld [vmem:[#allocation38_spill] sm:$0xff] }
 0x452   :  { %1285 = vmatprep.subr.mxu0 %v3514_v9  ;;  %1356 = vmatprep.subr.mxu1 %v3520_v10 }
 0x453   :  { %1286 = vmatpush1.msra.mxu0 %v3526_v12  ;;  %1357 = vmatpush1.msra.mxu1 %v3532_v14  ;;  %v3550_v12 = vld [vmem:[%s3795_s2] sm:$0xff]  ;;  %v4016_v14 = vld [vmem:[#allocation36_spill] sm:$0xff] }
 0x454   :  { %1287 = vmatprep.subr.mxu0 %v3538_v15  ;;  %1358 = vmatprep.subr.mxu1 %v3544_v16  ;;  %4014 = vst [vmem:[#allocation17_spill] sm:$0xff] %v3550_v12  ;;  %v3557_v15 = vld [vmem:[%s3795_s2 + $0x10] sm:$0xff] }
 0x455   :  { %1288 = vmatpush1.msra.mxu0 %v3550_v12  ;;  %1321 = vmatprep.mubr.f32.mxu0 %v3983_v23  ;;  %4015 = vst [vmem:[#allocation18_spill] sm:$0xff] %v3557_v15 }
 0x456   :  { %1359 = vmatpush1.msra.mxu1 %v3557_v15  ;;  %1392 = vmatprep.mubr.f32.mxu1 %v3983_v23 }
 0x457   :  { %1427 = vmatprep.subr.mxu0 %v3096_v25  ;;  %1498 = vmatprep.subr.mxu1 %v3102_v26 }
 0x4f6   :  { %v1153_v16 = vpop.f32.mrf.mxu0  ;;  %v1224_v6 = vpop.f32.mrf.mxu1 }
 0x4f7   :  { %v1229_v10 = vadd.f32 %v1153_v16, %v4016_v14  ;;  %v1231_v23 = vadd.f32 %v1224_v6, %v4019_v54  ;;  %v4025_v6 = vld [vmem:[#allocation7_spill] sm:$0xff] }
 0x4f8   :  { %v1155_v9 = vpop.f32.mrf.mxu0  ;;  %v1226_v29 = vpop.f32.mrf.mxu1 }
 0x4f9   :  { %v1877_v12 = vmul.f32 -1.442695, %v1229_v10  ;;  %v1230_v7 = vadd.f32 %v1155_v9, %v4017_v8  ;;  %v1232_v15 = vadd.f32 %v1226_v29, %v4018_v62  ;;  %v4024_v29 = vld [vmem:[#allocation25_spill] sm:$0xff] }
 0x4fb   :  { %2008 = vpow2.f32 %v1877_v12  ;;  %v1878_v5 = vmul.f32 -1.442695, %v1230_v7  ;;  %v1879_v51 = vmul.f32 -1.442695, %v1232_v15  ;;  %v4026_v15 = vld [vmem:[#allocation8_spill] sm:$0xff] }
 0x4fd   :  { %2010 = vpow2.f32 %v1878_v5 }
 0x4fe   :  { %2012 = vtanh.f32 %v1231_v23 }
 0x4ff   :  { %2014 = vpow2.f32 %v1879_v51  ;;  %v4023_v51 = vld [vmem:[#allocation27_spill] sm:$0xff] }
 0x508   :  { %v2009_v25 = vpop.eup %2008 }
 0x509   :  { %v1236_v50 = vadd.f32 1.0, %v2009_v25 }
 0x50a   :  { %v2011_v26 = vpop.eup %2010 }
 0x50b   :  { %2016 = vrcp.f32 %v1236_v50  ;;  %v1242_v14 = vadd.f32 1.0, %v2011_v26  ;;  %v2013_v10 = vpop.eup %2012  ;;  %v4020_v26 = vld [vmem:[#allocation3_spill] sm:$0xff]  ;;  %v4022_v50 = vld [vmem:[#allocation26_spill] sm:$0xff] }
 0x50c   :  { %v2015_v8 = vpop.eup %2014 }
 0x50d   :  { %2018 = vrcp.f32 %v1242_v14  ;;  %v1249_v5 = vadd.f32 1.0, %v2015_v8  ;;  %v4027_v14 = vld [vmem:[#allocation9_spill] sm:$0xff]  ;;  %v4029_v8 = vld [vmem:[#allocation11_spill] sm:$0xff] }
 0x50f   :  { %2020 = vrcp.f32 %v1249_v5  ;;  %v4033_v5 = vld [vmem:[#allocation15_spill] sm:$0xff] }
 0x518   :  { %v2017_v9 = vpop.eup %2016 }
 0x519   :  { %v1253_v12 = vmul.f32 %v2017_v9, %v2013_v10  ;;  %v4028_v10 = vld [vmem:[#allocation10_spill] sm:$0xff]  ;;  %v4030_v9 = vld [vmem:[#allocation12_spill] sm:$0xff] }
 0x51a   :  { %v2019_v7 = vpop.eup %2018 }
 0x51b   :  { %v1252_v16 = vmul.f32 %v2019_v7, %v3314_v13  ;;  %v4021_v13 = vld [vmem:[#allocation24_spill] sm:$0xff]  ;;  %v4032_v7 = vld [vmem:[#allocation14_spill] sm:$0xff] }
 0x51c   :  { %v2021_v25 = vpop.eup %2020 }
 0x51d   :  { %v3568_v62 = vadd.f32 %v1253_v12, %v1252_v16  ;;  %v4031_v12 = vld [vmem:[#allocation13_spill] sm:$0xff]  ;;  %v4034_v16 = vld [vmem:[#allocation16_spill] sm:$0xff] }
 0x51f   :  { %2022 = vtanh.f32 %v3568_v62 }
 0x52c   :  { %v2023_v23 = vpop.eup %2022 }
 0x52d   :  { %v1256_v54 = vmul.f32 %v2023_v23, %v2021_v25  ;;  %v4035_v25 = vld [vmem:[#allocation17_spill] sm:$0xff]  ;;  %v4036_v23 = vmov 0.0  }
 0x52f   :  { %1322 = vmatmul.mubr.f32.vlgmr.msra.gmra.mxu0 %v1256_v54  ;;  %1393 = vmatmul.mubr.f32.vlgmr.msra.gmra.mxu1 %v1256_v54  ;;  %v4037_v54 = vld [vmem:[#allocation18_spill] sm:$0xff] }
 0x530   :  { %1428 = vmatpush1.msra.mxu0 %v3116_v20  ;;  %1499 = vmatpush1.msra.mxu1 %v3122_v63 }
 0x531   :  { %1429 = vmatprep.subr.mxu0 %v3128_v47  ;;  %1500 = vmatprep.subr.mxu1 %v3134_v3 }
 0x532   :  { %1430 = vmatpush1.msra.mxu0 %v3140_v53  ;;  %1501 = vmatpush1.msra.mxu1 %v3146_v38 }
 0x533   :  { %1431 = vmatprep.subr.mxu0 %v3152_v59  ;;  %1502 = vmatprep.subr.mxu1 %v3158_v58 }
 0x534   :  { %1432 = vmatpush1.msra.mxu0 %v3164_v52  ;;  %1503 = vmatpush1.msra.mxu1 %v3170_v56 }
 0x535   :  { %1433 = vmatprep.subr.mxu0 %v3176_v57  ;;  %1504 = vmatprep.subr.mxu1 %v3182_v0 }
 0x536   :  { %1434 = vmatpush1.msra.mxu0 %v3188_v55  ;;  %1505 = vmatpush1.msra.mxu1 %v3194_v61 }
 0x537   :  { %1435 = vmatprep.subr.mxu0 %v3200_v60  ;;  %1506 = vmatprep.subr.mxu1 %v3206_v4 }
 0x538   :  { %1436 = vmatpush1.msra.mxu0 %v3212_v2  ;;  %1507 = vmatpush1.msra.mxu1 %v3218_v11 }
 0x539   :  { %1437 = vmatprep.subr.mxu0 %v3224_v1  ;;  %1508 = vmatprep.subr.mxu1 %v3230_v27 }
 0x53a   :  { %1438 = vmatpush1.msra.mxu0 %v3997_v17  ;;  %1509 = vmatpush1.msra.mxu1 %v3998_v18 }
 0x53b   :  { %1439 = vmatprep.subr.mxu0 %v3248_v32  ;;  %1510 = vmatprep.subr.mxu1 %v3254_v33 }
 0x53c   :  { %1440 = vmatpush1.msra.mxu0 %v3260_v28  ;;  %1511 = vmatpush1.msra.mxu1 %v3266_v31 }
 0x53d   :  { %1441 = vmatprep.subr.mxu0 %v3346_v19  ;;  %1512 = vmatprep.subr.mxu1 %v3352_v21 }
 0x53e   :  { %1442 = vmatpush1.msra.mxu0 %v3358_v22  ;;  %1513 = vmatpush1.msra.mxu1 %v3364_v24 }
 0x53f   :  { %1443 = vmatprep.subr.mxu0 %v3370_v30  ;;  %1514 = vmatprep.subr.mxu1 %v3376_v34 }
 0x540   :  { %1444 = vmatpush1.msra.mxu0 %v3382_v35  ;;  %1515 = vmatpush1.msra.mxu1 %v3388_v36 }
 0x541   :  { %1445 = vmatprep.subr.mxu0 %v3394_v37  ;;  %1516 = vmatprep.subr.mxu1 %v3400_v39 }
 0x542   :  { %1446 = vmatpush1.msra.mxu0 %v3406_v40  ;;  %1517 = vmatpush1.msra.mxu1 %v3412_v41 }
 0x543   :  { %1447 = vmatprep.subr.mxu0 %v3418_v42  ;;  %1518 = vmatprep.subr.mxu1 %v3424_v43 }
 0x544   :  { %1448 = vmatpush1.msra.mxu0 %v3430_v44  ;;  %1519 = vmatpush1.msra.mxu1 %v3436_v45 }
 0x545   :  { %1449 = vmatprep.subr.mxu0 %v3442_v46  ;;  %1520 = vmatprep.subr.mxu1 %v3448_v48 }
 0x546   :  { %1450 = vmatpush1.msra.mxu0 %v3454_v49  ;;  %1521 = vmatpush1.msra.mxu1 %v4020_v26 }
 0x547   :  { %1451 = vmatprep.subr.mxu0 %v4021_v13  ;;  %1522 = vmatprep.subr.mxu1 %v4022_v50  ;;  %v4043_v50 = vld [vmem:[#allocation41_spill] sm:$0xff] }
 0x548   :  { %1452 = vmatpush1.msra.mxu0 %v4023_v51  ;;  %1523 = vmatpush1.msra.mxu1 %v4024_v29  ;;  %v4042_v51 = vld [vmem:[#allocation43_spill] sm:$0xff] }
 0x549   :  { %1453 = vmatprep.subr.mxu0 %v4025_v6  ;;  %1524 = vmatprep.subr.mxu1 %v4026_v15 }
 0x54a   :  { %1454 = vmatpush1.msra.mxu0 %v4027_v14  ;;  %1525 = vmatpush1.msra.mxu1 %v4028_v10  ;;  %v4038_v10 = vld [vmem:[#allocation4_spill] sm:$0xff] }
 0x54b   :  { %1455 = vmatprep.subr.mxu0 %v4029_v8  ;;  %1526 = vmatprep.subr.mxu1 %v4030_v9  ;;  %v4039_v8 = vld [vmem:[#allocation5_spill] sm:$0xff] }
 0x54c   :  { %1456 = vmatpush1.msra.mxu0 %v4031_v12  ;;  %1527 = vmatpush1.msra.mxu1 %v4032_v7  ;;  %v4040_v12 = vld [vmem:[#allocation40_spill] sm:$0xff] }
 0x54d   :  { %1457 = vmatprep.subr.mxu0 %v4033_v5  ;;  %1528 = vmatprep.subr.mxu1 %v4034_v16  ;;  %v4041_v5 = vld [vmem:[#allocation42_spill] sm:$0xff] }
 0x54e   :  { %1458 = vmatpush1.msra.mxu0 %v4035_v25  ;;  %1491 = vmatprep.mubr.f32.mxu0 %v4036_v23 }
 0x54f   :  { %1529 = vmatpush1.msra.mxu1 %v4037_v54  ;;  %1562 = vmatprep.mubr.f32.mxu1 %v4036_v23 }
 0x550   :  { %1597 = vmatprep.subr.mxu0 %v4038_v10  ;;  %1668 = vmatprep.subr.mxu1 %v4039_v8 }
 0x5ef   :  { %v1323_v9 = vpop.f32.mrf.mxu0  ;;  %v1394_v16 = vpop.f32.mrf.mxu1 }
 0x5f0   :  { %v1399_v14 = vadd.f32 %v1323_v9, %v4040_v12  ;;  %v1401_v23 = vadd.f32 %v1394_v16, %v4043_v50 }
 0x5f1   :  { %v1325_v7 = vpop.f32.mrf.mxu0  ;;  %v1396_v29 = vpop.f32.mrf.mxu1 }
 0x5f2   :  { %v1880_v15 = vmul.f32 -1.442695, %v1399_v14  ;;  %v1400_v6 = vadd.f32 %v1325_v7, %v4041_v5  ;;  %v1402_v54 = vadd.f32 %v1396_v29, %v4042_v51 }
 0x5f4   :  { %2024 = vpow2.f32 %v1880_v15  ;;  %v1881_v25 = vmul.f32 -1.442695, %v1400_v6  ;;  %v1882_v13 = vmul.f32 -1.442695, %v1402_v54  ;;  %v1781_v54 = vld [vmem:[%s3797_s4 + $0x70] sm:$0xff] }
 0x5f6   :  { %2026 = vpow2.f32 %v1881_v25 }
 0x5f7   :  { %2028 = vtanh.f32 %v1401_v23  ;;  %v1782_v23 = vld [vmem:[%s3797_s4 + $0x78] sm:$0xff] }
 0x5f8   :  { %2030 = vpow2.f32 %v1882_v13 }
 0x601   :  { %v2025_v10 = vpop.eup %2024 }
 0x602   :  { %v1406_v26 = vadd.f32 1.0, %v2025_v10  ;;  %v1780_v10 = vld [vmem:[%s3797_s4 + $0x68] sm:$0xff] }
 0x603   :  { %v2027_v8 = vpop.eup %2026 }
 0x604   :  { %2032 = vrcp.f32 %v1406_v26  ;;  %v1412_v9 = vadd.f32 1.0, %v2027_v8  ;;  %v2029_v14 = vpop.eup %2028  ;;  %v1779_v8 = vld [vmem:[%s3797_s4 + $0x60] sm:$0xff] }
 0x605   :  { %v2031_v12 = vpop.eup %2030 }
 0x606   :  { %2034 = vrcp.f32 %v1412_v9  ;;  %v1419_v5 = vadd.f32 1.0, %v2031_v12  ;;  %v1778_v9 = vld [vmem:[%s3797_s4 + $0x58] sm:$0xff]  ;;  %v1776_v12 = vld [vmem:[%s3797_s4 + $0x48] sm:$0xff] }
 0x608   :  { %2036 = vrcp.f32 %v1419_v5  ;;  %v1772_v5 = vld [vmem:[%s3797_s4 + $0x28] sm:$0xff] }
 0x611   :  { %v2033_v15 = vpop.eup %2032 }
 0x612   :  { %v1423_v7 = vmul.f32 %v2033_v15, %v2029_v14  ;;  %v1777_v14 = vld [vmem:[%s3797_s4 + $0x50] sm:$0xff]  ;;  %v1775_v15 = vld [vmem:[%s3797_s4 + $0x40] sm:$0xff] }
 0x613   :  { %v2035_v6 = vpop.eup %2034 }
 0x614   :  { %v1422_v25 = vmul.f32 %v2035_v6, %v3568_v62  ;;  %v1773_v6 = vld [vmem:[%s3797_s4 + $0x30] sm:$0xff] }
 0x615   :  { %v2037_v50 = vpop.eup %2036 }
 0x616   :  { %v3642_v51 = vadd.f32 %v1423_v7, %v1422_v25  ;;  %v1774_v7 = vld [vmem:[%s3797_s4 + $0x38] sm:$0xff]  ;;  %v1771_v25 = vld [vmem:[%s3797_s4 + $0x20] sm:$0xff] }
 0x618   :  { %2038 = vtanh.f32 %v3642_v51 }
 0x625   :  { %v2039_v29 = vpop.eup %2038 }
 0x626   :  { %v1426_v16 = vmul.f32 %v2039_v29, %v2037_v50  ;;  %v1769_v50 = vld [vmem:[%s3797_s4 + $0x10] sm:$0xff]  ;;  %v1768_v29 = vld [vmem:[%s3797_s4 + $0x8] sm:$0xff] }
 0x628   :  { %1492 = vmatmul.mubr.f32.vlgmr.msra.gmra.mxu0 %v1426_v16  ;;  %1563 = vmatmul.mubr.f32.vlgmr.msra.gmra.mxu1 %v1426_v16  ;;  %v1767_v16 = vld [vmem:[%s3797_s4] sm:$0xff] }
 0x629   :  { %1598 = vmatpush1.msra.mxu0 %v3116_v20  ;;  %1669 = vmatpush1.msra.mxu1 %v3122_v63  ;;  %v4044_v20 = vld [vmem:[#allocation3_spill] sm:$0xff]  ;;  %v4045_v63 = vld [vmem:[#allocation24_spill] sm:$0xff] }
 0x62a   :  { %1599 = vmatprep.subr.mxu0 %v3128_v47  ;;  %1670 = vmatprep.subr.mxu1 %v3134_v3  ;;  %v4046_v47 = vld [vmem:[#allocation26_spill] sm:$0xff]  ;;  %v4047_v3 = vld [vmem:[#allocation27_spill] sm:$0xff] }
 0x62b   :  { %1600 = vmatpush1.msra.mxu0 %v3140_v53  ;;  %1671 = vmatpush1.msra.mxu1 %v3146_v38  ;;  %v4048_v53 = vld [vmem:[#allocation25_spill] sm:$0xff]  ;;  %v4049_v38 = vld [vmem:[#allocation7_spill] sm:$0xff] }
 0x62c   :  { %1601 = vmatprep.subr.mxu0 %v3152_v59  ;;  %1672 = vmatprep.subr.mxu1 %v3158_v58  ;;  %v4050_v59 = vld [vmem:[#allocation8_spill] sm:$0xff]  ;;  %v4051_v58 = vld [vmem:[#allocation9_spill] sm:$0xff] }
 0x62d   :  { %1602 = vmatpush1.msra.mxu0 %v3164_v52  ;;  %1673 = vmatpush1.msra.mxu1 %v3170_v56  ;;  %v4052_v52 = vld [vmem:[#allocation10_spill] sm:$0xff]  ;;  %v4053_v56 = vld [vmem:[#allocation11_spill] sm:$0xff] }
 0x62e   :  { %1603 = vmatprep.subr.mxu0 %v3176_v57  ;;  %1674 = vmatprep.subr.mxu1 %v3182_v0  ;;  %v4054_v57 = vld [vmem:[#allocation12_spill] sm:$0xff]  ;;  %v4055_v0 = vld [vmem:[#allocation13_spill] sm:$0xff] }
 0x62f   :  { %1604 = vmatpush1.msra.mxu0 %v3188_v55  ;;  %1675 = vmatpush1.msra.mxu1 %v3194_v61  ;;  %v4056_v55 = vld [vmem:[#allocation14_spill] sm:$0xff]  ;;  %v4057_v61 = vld [vmem:[#allocation15_spill] sm:$0xff] }
 0x630   :  { %1605 = vmatprep.subr.mxu0 %v3200_v60  ;;  %1676 = vmatprep.subr.mxu1 %v3206_v4  ;;  %v4058_v60 = vld [vmem:[#allocation16_spill] sm:$0xff]  ;;  %v4059_v4 = vld [vmem:[#allocation17_spill] sm:$0xff] }
 0x631   :  { %1606 = vmatpush1.msra.mxu0 %v3212_v2  ;;  %1677 = vmatpush1.msra.mxu1 %v3218_v11  ;;  %v4060_v2 = vmov 0.0   ;;  %v4061_v11 = vld [vmem:[#allocation18_spill] sm:$0xff] }
 0x632   :  { %1607 = vmatprep.subr.mxu0 %v3224_v1  ;;  %1678 = vmatprep.subr.mxu1 %v3230_v27  ;;  %v4062_v27 = vld [vmem:[#allocation44_spill] sm:$0xff] }
 0x633   :  { %1608 = vmatpush1.msra.mxu0 %v3997_v17  ;;  %1679 = vmatpush1.msra.mxu1 %v3998_v18 }
 0x634   :  { %1609 = vmatprep.subr.mxu0 %v3248_v32  ;;  %1680 = vmatprep.subr.mxu1 %v3254_v33  ;;  %v4063_v33 = vld [vmem:[#allocation46_spill] sm:$0xff] }
 0x635   :  { %1610 = vmatpush1.msra.mxu0 %v3260_v28  ;;  %1681 = vmatpush1.msra.mxu1 %v3266_v31 }
 0x636   :  { %1611 = vmatprep.subr.mxu0 %v3346_v19  ;;  %1682 = vmatprep.subr.mxu1 %v3352_v21 }
 0x637   :  { %1612 = vmatpush1.msra.mxu0 %v3358_v22  ;;  %1683 = vmatpush1.msra.mxu1 %v3364_v24  ;;  %v4064_v22 = vld [vmem:[#allocation47_spill] sm:$0xff] }
 0x638   :  { %1613 = vmatprep.subr.mxu0 %v3370_v30  ;;  %1684 = vmatprep.subr.mxu1 %v3376_v34  ;;  %v4065_v30 = vld [vmem:[#allocation45_spill] sm:$0xff] }
 0x639   :  { %1614 = vmatpush1.msra.mxu0 %v3382_v35  ;;  %1685 = vmatpush1.msra.mxu1 %v3388_v36 }
 0x63a   :  { %1615 = vmatprep.subr.mxu0 %v3394_v37  ;;  %1686 = vmatprep.subr.mxu1 %v3400_v39 }
 0x63b   :  { %1616 = vmatpush1.msra.mxu0 %v3406_v40  ;;  %1687 = vmatpush1.msra.mxu1 %v3412_v41 }
 0x63c   :  { %1617 = vmatprep.subr.mxu0 %v3418_v42  ;;  %1688 = vmatprep.subr.mxu1 %v3424_v43 }
 0x63d   :  { %1618 = vmatpush1.msra.mxu0 %v3430_v44  ;;  %1689 = vmatpush1.msra.mxu1 %v3436_v45 }
 0x63e   :  { %1619 = vmatprep.subr.mxu0 %v3442_v46  ;;  %1690 = vmatprep.subr.mxu1 %v3448_v48 }
 0x63f   :  { %1620 = vmatpush1.msra.mxu0 %v3454_v49  ;;  %1691 = vmatpush1.msra.mxu1 %v4044_v20 }
 0x640   :  { %1621 = vmatprep.subr.mxu0 %v4045_v63  ;;  %1692 = vmatprep.subr.mxu1 %v4046_v47  ;;  %v4066_v63 = vld [vmem:[#allocation48_spill] sm:$0xff] }
 0x641   :  { %1622 = vmatpush1.msra.mxu0 %v4047_v3  ;;  %1693 = vmatpush1.msra.mxu1 %v4048_v53 }
 0x642   :  { %1623 = vmatprep.subr.mxu0 %v4049_v38  ;;  %1694 = vmatprep.subr.mxu1 %v4050_v59  ;;  %v4067_v38 = vld [vmem:[#allocation50_spill] sm:$0xff] }
 0x643   :  { %1624 = vmatpush1.msra.mxu0 %v4051_v58  ;;  %1695 = vmatpush1.msra.mxu1 %v4052_v52 }
 0x644   :  { %1625 = vmatprep.subr.mxu0 %v4053_v56  ;;  %1696 = vmatprep.subr.mxu1 %v4054_v57  ;;  %v4068_v57 = vld [vmem:[#allocation51_spill] sm:$0xff] }
 0x645   :  { %1626 = vmatpush1.msra.mxu0 %v4055_v0  ;;  %1697 = vmatpush1.msra.mxu1 %v4056_v55  ;;  %v4069_v55 = vld [vmem:[#allocation49_spill] sm:$0xff] }
 0x646   :  { %1627 = vmatprep.subr.mxu0 %v4057_v61  ;;  %1698 = vmatprep.subr.mxu1 %v4058_v60 }
 0x647   :  { %1628 = vmatpush1.msra.mxu0 %v4059_v4  ;;  %1661 = vmatprep.mubr.f32.mxu0 %v4060_v2 }
 0x648   :  { %1699 = vmatpush1.msra.mxu1 %v4061_v11  ;;  %1732 = vmatprep.mubr.f32.mxu1 %v4060_v2 }
 0x649   :  { %1907 = vmatprep.subr.mxu0 %v4060_v2 }
 0x6e8   :  { %v1493_v1 = vpop.f32.mrf.mxu0  ;;  %v1564_v18 = vpop.f32.mrf.mxu1 }
 0x6e9   :  { %v1569_v28 = vadd.f32 %v1493_v1, %v4062_v27  ;;  %v1571_v34 = vadd.f32 %v1564_v18, %v4065_v30  ;;  %v1889_v30 = vld [vmem:[%s3798_s5] ss:$0 sm:$0xff] }
 0x6ea   :  { %v1495_v31 = vpop.f32.mrf.mxu0  ;;  %v1566_v21 = vpop.f32.mrf.mxu1 }
 0x6eb   :  { %v1883_v32 = vmul.f32 -1.442695, %v1569_v28  ;;  %v1570_v17 = vadd.f32 %v1495_v31, %v4063_v33  ;;  %v1572_v24 = vadd.f32 %v1566_v21, %v4064_v22 }
 0x6ed   :  { %2040 = vpow2.f32 %v1883_v32  ;;  %v1884_v19 = vmul.f32 -1.442695, %v1570_v17  ;;  %v1885_v35 = vmul.f32 -1.442695, %v1572_v24 }
 0x6ef   :  { %2042 = vpow2.f32 %v1884_v19 }
 0x6f0   :  { %2044 = vtanh.f32 %v1571_v34 }
 0x6f1   :  { %2046 = vpow2.f32 %v1885_v35 }
 0x6fa   :  { %v2041_v36 = vpop.eup %2040 }
 0x6fb   :  { %v1576_v37 = vadd.f32 1.0, %v2041_v36 }
 0x6fc   :  { %v2043_v39 = vpop.eup %2042 }
 0x6fd   :  { %2048 = vrcp.f32 %v1576_v37  ;;  %v1582_v40 = vadd.f32 1.0, %v2043_v39  ;;  %v2045_v41 = vpop.eup %2044 }
 0x6fe   :  { %v2047_v42 = vpop.eup %2046 }
 0x6ff   :  { %2050 = vrcp.f32 %v1582_v40  ;;  %v1589_v46 = vadd.f32 1.0, %v2047_v42 }
 0x701   :  { %2052 = vrcp.f32 %v1589_v46 }
 0x70a   :  { %v2049_v43 = vpop.eup %2048 }
 0x70b   :  { %v1593_v44 = vmul.f32 %v2049_v43, %v2045_v41 }
 0x70c   :  { %v2051_v45 = vpop.eup %2050 }
 0x70d   :  { %v1592_v48 = vmul.f32 %v2051_v45, %v3642_v51  ;;  %v1770_v51 = vld [vmem:[%s3797_s4 + $0x18] sm:$0xff] }
 0x70e   :  { %v2053_v62 = vpop.eup %2052 }
 0x70f   :  { %v3715_v49 = vadd.f32 %v1593_v44, %v1592_v48 }
 0x711   :  { %2054 = vtanh.f32 %v3715_v49 }
 0x71e   :  { %v2055_v26 = vpop.eup %2054 }
 0x71f   :  { %v1596_v13 = vmul.f32 %v2055_v26, %v2053_v62 }
 0x721   :  { %1662 = vmatmul.mubr.f32.vlgmr.msra.gmra.mxu0 %v1596_v13  ;;  %1733 = vmatmul.mubr.f32.vlgmr.msra.gmra.mxu1 %v1596_v13 }
 0x722   :  { %1908 = vmatpush3.msra.mxu0 %v1782_v23  ;;  %1939 = vmatprep.mubr.msk.f32.mxu0 %vm2137_vm0, %v4060_v2 }
 0x723   :  { %1909 = vmatprep.subr.mxu0 %v4060_v2 }
 0x724   :  { %1910 = vmatpush3.msra.mxu0 %v1781_v54 }
 0x725   :  { %1911 = vmatprep.subr.mxu0 %v4060_v2 }
 0x726   :  { %1912 = vmatpush3.msra.mxu0 %v1780_v10 }
 0x727   :  { %1913 = vmatprep.subr.mxu0 %v4060_v2 }
 0x728   :  { %1914 = vmatpush3.msra.mxu0 %v1779_v8 }
 0x729   :  { %1915 = vmatprep.subr.mxu0 %v4060_v2 }
 0x72a   :  { %1916 = vmatpush3.msra.mxu0 %v1778_v9 }
 0x72b   :  { %1917 = vmatprep.subr.mxu0 %v4060_v2 }
 0x72c   :  { %1918 = vmatpush3.msra.mxu0 %v1777_v14 }
 0x72d   :  { %1919 = vmatprep.subr.mxu0 %v4060_v2 }
 0x72e   :  { %1920 = vmatpush3.msra.mxu0 %v1776_v12 }
 0x72f   :  { %1921 = vmatprep.subr.mxu0 %v4060_v2 }
 0x730   :  { %1922 = vmatpush3.msra.mxu0 %v1775_v15 }
 0x731   :  { %1923 = vmatprep.subr.mxu0 %v4060_v2 }
 0x732   :  { %1924 = vmatpush3.msra.mxu0 %v1774_v7 }
 0x733   :  { %1925 = vmatprep.subr.mxu0 %v4060_v2 }
 0x734   :  { %1926 = vmatpush3.msra.mxu0 %v1773_v6 }
 0x735   :  { %1927 = vmatprep.subr.mxu0 %v4060_v2 }
 0x736   :  { %1928 = vmatpush3.msra.mxu0 %v1772_v5 }
 0x737   :  { %1929 = vmatprep.subr.mxu0 %v4060_v2 }
 0x738   :  { %1930 = vmatpush3.msra.mxu0 %v1771_v25 }
 0x739   :  { %1931 = vmatprep.subr.mxu0 %v4060_v2 }
 0x73a   :  { %1932 = vmatpush3.msra.mxu0 %v1770_v51 }
 0x73b   :  { %1933 = vmatprep.subr.mxu0 %v4060_v2 }
 0x73c   :  { %1934 = vmatpush3.msra.mxu0 %v1769_v50 }
 0x73d   :  { %1935 = vmatprep.subr.mxu0 %v4060_v2 }
 0x73e   :  { %1936 = vmatpush3.msra.mxu0 %v1768_v29 }
 0x73f   :  { %1937 = vmatprep.subr.mxu0 %v4060_v2 }
 0x740   :  { %1938 = vmatpush3.msra.mxu0 %v1767_v16 }
 0x7e1   :  { %v1663_v20 = vpop.f32.mrf.mxu0  ;;  %v1734_v58 = vpop.f32.mrf.mxu1 }
 0x7e2   :  { %v1739_v47 = vadd.f32 %v1663_v20, %v4066_v63  ;;  %v1741_v61 = vadd.f32 %v1734_v58, %v4069_v55 }
 0x7e3   :  { %v1665_v3 = vpop.f32.mrf.mxu0  ;;  %v1736_v56 = vpop.f32.mrf.mxu1 }
 0x7e4   :  { %v1886_v53 = vmul.f32 -1.442695, %v1739_v47  ;;  %v1740_v59 = vadd.f32 %v1665_v3, %v4067_v38  ;;  %v1742_v0 = vadd.f32 %v1736_v56, %v4068_v57 }
 0x7e6   :  { %2056 = vpow2.f32 %v1886_v53  ;;  %v1887_v52 = vmul.f32 -1.442695, %v1740_v59  ;;  %v1888_v60 = vmul.f32 -1.442695, %v1742_v0 }
 0x7e8   :  { %2058 = vpow2.f32 %v1887_v52 }
 0x7e9   :  { %2060 = vtanh.f32 %v1741_v61 }
 0x7ea   :  { %2062 = vpow2.f32 %v1888_v60 }
 0x7f3   :  { %v2057_v4 = vpop.eup %2056 }
 0x7f4   :  { %v1746_v2 = vadd.f32 1.0, %v2057_v4 }
 0x7f5   :  { %v2059_v11 = vpop.eup %2058 }
 0x7f6   :  { %2064 = vrcp.f32 %v1746_v2  ;;  %v1752_v1 = vadd.f32 1.0, %v2059_v11  ;;  %v2061_v27 = vpop.eup %2060 }
 0x7f7   :  { %v2063_v28 = vpop.eup %2062 }
 0x7f8   :  { %2066 = vrcp.f32 %v1752_v1  ;;  %v1759_v17 = vadd.f32 1.0, %v2063_v28 }
 0x7fa   :  { %2068 = vrcp.f32 %v1759_v17 }
 0x803   :  { %v2065_v31 = vpop.eup %2064 }
 0x804   :  { %v1763_v32 = vmul.f32 %v2065_v31, %v2061_v27 }
 0x805   :  { %v2067_v33 = vpop.eup %2066 }
 0x806   :  { %v1762_v18 = vmul.f32 %v2067_v33, %v3715_v49 }
 0x807   :  { %v2069_v21 = vpop.eup %2068 }
 0x808   :  { %v1764_v19 = vadd.f32 %v1763_v32, %v1762_v18 }
 0x80a   :  { %2070 = vtanh.f32 %v1764_v19 }
 0x817   :  { %v2071_v22 = vpop.eup %2070 }
 0x818   :  { %v1766_v24 = vmul.f32 %v2071_v22, %v2069_v21 }
 0x81a   :  { %1940 = vmatmul.mubr.f32.vlgmr.msra.gmra.mxu0 %v1766_v24 }
 0x8da   :  { %v1856_v34 = vpop.f32.mrf.mxu0 }
 0x8db   :  { %v1857_v35 = vadd.f32 %v1889_v30, %v1856_v34 }
 0x8dc   :  { %v1941_v36 = vpop.f32.mrf.mxu0 }
 0x8dd   :  { %1860 = vst [vmem:[%s3799_s6] sm:$0xff] %v1857_v35 }

</bundles_post_ra>
